<compile_context>
chip_gen: v7x
topology: tpu7x:2x2x1
jax: 0.10.0
libtpu: 0.0.40
codegen_flags: <defaults>
</compile_context>

<pallas_src>
import math
import functools

import jax
import jax.numpy as jnp
from jax.experimental import pallas as pl
from jax.experimental.pallas import tpu as pltpu


def _layernorm(x, gamma, beta, eps=1e-5):
    # x: (T, C) f32; gamma/beta: (1, C) f32. Biased variance, like nn.LayerNorm.
    mean = jnp.mean(x, axis=-1, keepdims=True)
    var = jnp.mean((x - mean) ** 2, axis=-1, keepdims=True)
    return (x - mean) * jax.lax.rsqrt(var + eps) * gamma + beta


# -----------------------------------------------------------------------------
# Kernel 1: LayerNorm1 + QKV projection, one (tq, C) sequence tile per grid step.
# -----------------------------------------------------------------------------
def qkv_kernel(x_ref, ln1_g_ref, ln1_b_ref, w_qkv_ref, b_qkv_ref,
               q_ref, k_ref, v_ref):
    C = x_ref.shape[-1]
    h = _layernorm(x_ref[...], ln1_g_ref[...], ln1_b_ref[...])          # f32
    qkv = jnp.dot(h.astype(jnp.bfloat16), w_qkv_ref[...],
                  preferred_element_type=jnp.float32) + b_qkv_ref[...]  # (tq, 3C) f32
    q_ref[...] = qkv[:, 0 * C:1 * C].astype(q_ref.dtype)
    k_ref[...] = qkv[:, 1 * C:2 * C].astype(k_ref.dtype)
    v_ref[...] = qkv[:, 2 * C:3 * C].astype(v_ref.dtype)


# -----------------------------------------------------------------------------
# Kernel 2: flash attention + attn proj + residual + LayerNorm2 + MLP + residual.
# Grid: (B, num_q_tiles, num_kv_tiles); KV axis innermost / "arbitrary".
# -----------------------------------------------------------------------------
def attn_mlp_kernel(xq_ref, q_ref, k_ref, v_ref,
                    w_ap_ref, b_ap_ref, ln2_g_ref, ln2_b_ref,
                    w_fc_ref, b_fc_ref, w_mp_ref, b_mp_ref,
                    out_ref,
                    m_sc, l_sc, acc_sc,
                    *, n_head, tq, tk):
    qi = pl.program_id(1)
    ki = pl.program_id(2)
    n_kv = pl.num_programs(2)
    C = xq_ref.shape[-1]
    hd = C // n_head
    scale = 1.0 / math.sqrt(hd)

    @pl.when(ki == 0)
    def _init():
        m_sc[...] = jnp.full_like(m_sc, -jnp.inf)
        l_sc[...] = jnp.zeros_like(l_sc)
        acc_sc[...] = jnp.zeros_like(acc_sc)

    # Skip KV tiles that lie entirely above the causal diagonal for this Q tile.
    @pl.when(ki * tk < (qi + 1) * tq)
    def _update():
        # Per-tile causal mask from tile-offset iotas (only (tq, tk) transients).
        row = qi * tq + jax.lax.broadcasted_iota(jnp.int32, (tq, tk), 0)
        col = ki * tk + jax.lax.broadcasted_iota(jnp.int32, (tq, tk), 1)
        causal = col <= row

        q = q_ref[...]          # (tq, C) bf16
        k = k_ref[...]          # (tk, C) bf16
        v = v_ref[...]          # (tk, C) bf16
        for h in range(n_head):
            qh = q[:, h * hd:(h + 1) * hd]
            kh = k[:, h * hd:(h + 1) * hd]
            vh = v[:, h * hd:(h + 1) * hd]
            # q @ k^T: contract last dims directly, no explicit transpose of kh.
            s = jax.lax.dot_general(
                qh, kh, (((1,), (1,)), ((), ())),
                preferred_element_type=jnp.float32) * scale             # (tq, tk) f32
            s = jnp.where(causal, s, -jnp.inf)
            m_prev = m_sc[h]                                            # (tq, 1)
            m_new = jnp.maximum(m_prev, s.max(axis=-1, keepdims=True))
            alpha = jnp.exp(m_prev - m_new)
            p = jnp.exp(s - m_new)                                      # (tq, tk) f32
            l_sc[h] = alpha * l_sc[h] + p.sum(axis=-1, keepdims=True)
            acc_sc[h] = alpha * acc_sc[h] + jnp.dot(
                p.astype(jnp.bfloat16), vh, preferred_element_type=jnp.float32)
            m_sc[h] = m_new

    @pl.when(ki == n_kv - 1)
    def _finalize():
        x = xq_ref[...]                                                 # (tq, C) f32
        # Assemble normalized per-head outputs into a lane-dense (tq, C) tile.
        heads = []
        for h in range(n_head):
            inv_l = pl.reciprocal(l_sc[h], approx=True)
            heads.append(acc_sc[h] * inv_l)
        y = jnp.concatenate(heads, axis=-1)                             # (tq, C) f32
        y = jnp.dot(y.astype(jnp.bfloat16), w_ap_ref[...],
                    preferred_element_type=jnp.float32) + b_ap_ref[...]
        x = x + y                                                       # first residual
        h2 = _layernorm(x, ln2_g_ref[...], ln2_b_ref[...])
        ff = jnp.dot(h2.astype(jnp.bfloat16), w_fc_ref[...],
                     preferred_element_type=jnp.float32) + b_fc_ref[...]
        ff = jax.nn.gelu(ff, approximate=False)                         # exact erf (nn.GELU())
        ff = jnp.dot(ff.astype(jnp.bfloat16), w_mp_ref[...],
                     preferred_element_type=jnp.float32) + b_mp_ref[...]
        out_ref[...] = (x + ff).astype(out_ref.dtype)                   # second residual


def _full_spec(arr):
    zeros = (0,) * arr.ndim
    return pl.BlockSpec(arr.shape, lambda *_: zeros)


def gpt_block(x, params, *, n_head, tq=None, tk=None):
    B, T, C = x.shape
    assert C % n_head == 0
    tq = min(T, 256) if tq is None else tq
    tk = min(T, 256) if tk is None else tk
    assert T % tq == 0 and T % tk == 0
    n_q, n_kv = T // tq, T // tk
    hd = C // n_head

    bf16 = jnp.bfloat16
    # bf16 matmul operands (weights cast once here, activations cast in-kernel).
    w_qkv = params["w_qkv"].astype(bf16)
    w_ap = params["w_attnproj"].astype(bf16)
    w_fc = params["w_fc"].astype(bf16)
    w_mp = params["w_mlpproj"].astype(bf16)

    # ---- kernel 1: LN1 + QKV projection ----
    qkv_cost = pl.CostEstimate(
        flops=2 * B * T * C * 3 * C,
        transcendentals=0,
        bytes_accessed=4 * B * T * C + 2 * C * 3 * C + 3 * 2 * B * T * C,
    )
    q, k, v = pl.pallas_call(
        qkv_kernel,
        out_shape=tuple(jax.ShapeDtypeStruct((B, T, C), bf16) for _ in range(3)),
        grid_spec=pltpu.PrefetchScalarGridSpec(
            num_scalar_prefetch=0,
            grid=(B, n_q),
            in_specs=[
                pl.BlockSpec((pl.Squeezed(), tq, C), lambda b, i: (b, i, 0)),
                _full_spec(params["ln1_g"]),
                _full_spec(params["ln1_b"]),
                _full_spec(w_qkv),
                _full_spec(params["b_qkv"]),
            ],
            out_specs=tuple(
                pl.BlockSpec((pl.Squeezed(), tq, C), lambda b, i: (b, i, 0))
                for _ in range(3)),
        ),
        compiler_params=pltpu.CompilerParams(
            dimension_semantics=("parallel", "parallel"),
            vmem_limit_bytes=64 * 1024 * 1024,
        ),
        cost_estimate=qkv_cost,
    )(x, params["ln1_g"], params["ln1_b"], w_qkv, params["b_qkv"])

    # ---- kernel 2: flash attention + proj + residual + LN2 + MLP + residual ----
    attn_cost = pl.CostEstimate(
        flops=4 * B * T * T * C + 2 * B * T * C * C + 16 * B * T * C * C,
        transcendentals=B * n_head * T * T + 4 * B * T * C,
        bytes_accessed=(4 + 3 * 2 + 4) * B * T * C + 2 * 9 * C * C,
    )
    qspec = pl.BlockSpec((pl.Squeezed(), tq, C), lambda b, qi, ki: (b, qi, 0))
    kspec = pl.BlockSpec((pl.Squeezed(), tk, C), lambda b, qi, ki: (b, ki, 0))

    out = pl.pallas_call(
        functools.partial(attn_mlp_kernel, n_head=n_head, tq=tq, tk=tk),
        out_shape=jax.ShapeDtypeStruct((B, T, C), x.dtype),
        grid_spec=pltpu.PrefetchScalarGridSpec(
            num_scalar_prefetch=0,
            grid=(B, n_q, n_kv),
            in_specs=[
                qspec,                                  # residual-stream x (q-tile indexed)
                qspec,                                  # q
                kspec,                                  # k
                kspec,                                  # v
                _full_spec(w_ap),
                _full_spec(params["b_attnproj"]),
                _full_spec(params["ln2_g"]),
                _full_spec(params["ln2_b"]),
                _full_spec(w_fc),
                _full_spec(params["b_fc"]),
                _full_spec(w_mp),
                _full_spec(params["b_mlpproj"]),
            ],
            out_specs=pl.BlockSpec((pl.Squeezed(), tq, C),
                                   lambda b, qi, ki: (b, qi, 0)),
            scratch_shapes=[
                pltpu.VMEM((n_head, tq, 1), jnp.float32),   # running max m
                pltpu.VMEM((n_head, tq, 1), jnp.float32),   # running sum l
                pltpu.VMEM((n_head, tq, hd), jnp.float32),  # output accumulator
            ],
        ),
        compiler_params=pltpu.CompilerParams(
            dimension_semantics=("parallel", "parallel", "arbitrary"),
            vmem_limit_bytes=64 * 1024 * 1024,
        ),
        cost_estimate=attn_cost,
    )(x, q, k, v,
      w_ap, params["b_attnproj"], params["ln2_g"], params["ln2_b"],
      w_fc, params["b_fc"], w_mp, params["b_mlpproj"])
    return out


def init_params(key, C):
    ks = jax.random.split(key, 10)
    std = 0.02
    return {
        # LayerNorm params kept 2D (1, C) for TPU-friendly layout
        "ln1_g": 1.0 + 0.01 * jax.random.normal(ks[0], (1, C), jnp.float32),
        "ln1_b": 0.01 * jax.random.normal(ks[1], (1, C), jnp.float32),
        "w_qkv": std * jax.random.normal(ks[2], (C, 3 * C), jnp.float32),
        "b_qkv": std * jax.random.normal(ks[3], (1, 3 * C), jnp.float32),
        "w_attnproj": std * jax.random.normal(ks[4], (C, C), jnp.float32),
        "b_attnproj": std * jax.random.normal(ks[5], (1, C), jnp.float32),
        "ln2_g": 1.0 + 0.01 * jax.random.normal(ks[6], (1, C), jnp.float32),
        "ln2_b": 0.01 * jax.random.normal(ks[7], (1, C), jnp.float32),
        "w_fc": std * jax.random.normal(ks[8], (C, 4 * C), jnp.float32),
        "b_fc": jnp.zeros((1, 4 * C), jnp.float32),
        "w_mlpproj": std * jax.random.normal(ks[9], (4 * C, C), jnp.float32),
        "b_mlpproj": jnp.zeros((1, C), jnp.float32),
    }


def reference_block(x, p, n_head):
    # pure-JAX f32 reference matching the PyTorch forward (dropout=0, eval)
    B, T, C = x.shape
    hd = C // n_head

    def ln(v, g, b):
        m = jnp.mean(v, axis=-1, keepdims=True)
        var = jnp.mean((v - m) ** 2, axis=-1, keepdims=True)
        return (v - m) / jnp.sqrt(var + 1e-5) * g + b

    h = ln(x, p["ln1_g"], p["ln1_b"])
    qkv = h @ p["w_qkv"] + p["b_qkv"]
    q, k, v = jnp.split(qkv, 3, axis=-1)
    q = q.reshape(B, T, n_head, hd).transpose(0, 2, 1, 3)
    k = k.reshape(B, T, n_head, hd).transpose(0, 2, 1, 3)
    v = v.reshape(B, T, n_head, hd).transpose(0, 2, 1, 3)
    att = (q @ jnp.swapaxes(k, -2, -1)) / math.sqrt(hd)
    mask = jnp.tril(jnp.ones((T, T), bool))
    att = jnp.where(mask, att, -jnp.inf)
    att = jax.nn.softmax(att, axis=-1)
    y = (att @ v).transpose(0, 2, 1, 3).reshape(B, T, C)
    y = y @ p["w_attnproj"] + p["b_attnproj"]
    x = x + y
    h2 = ln(x, p["ln2_g"], p["ln2_b"])
    ff = jax.nn.gelu(h2 @ p["w_fc"] + p["b_fc"], approximate=False)
    ff = ff @ p["w_mlpproj"] + p["b_mlpproj"]
    return x + ff


if __name__ == "__main__":
    # Small but TPU-tile-friendly config: head_dim = 128 (lane aligned), T,C multiples of 128.
    B, T, C, n_head = 2, 256, 256, 2    # block_size == T, bias=True, dropout=0.0
    key = jax.random.PRNGKey(0)
    kx, kp = jax.random.split(key)
    x = jax.random.normal(kx, (B, T, C), jnp.float32)
    params = init_params(kp, C)

    out = gpt_block(x, params, n_head=n_head, tq=128, tk=128)
    out = jax.block_until_ready(out)

    ref = reference_block(x, params, n_head)
    max_err = jnp.max(jnp.abs(out - ref))
    # bf16 matmul operands (f32 accumulation) => small deviation from the f32 reference.
    assert jnp.allclose(out, ref, atol=2e-2, rtol=2e-2), f"mismatch: max abs err {max_err}"

    print("KERNEL_OK")
</pallas_src>

<mosaic_0001>
module attributes {stable_mosaic.version = 11 : i64} {
  func.func @qkv_kernel(%arg0: i32, %arg1: i32, %arg2: memref<1x128x256xf32, #tpu.memory_space<vmem>>, %arg3: memref<1x256xf32, #tpu.memory_space<vmem>>, %arg4: memref<1x256xf32, #tpu.memory_space<vmem>>, %arg5: memref<256x768xbf16, #tpu.memory_space<vmem>>, %arg6: memref<1x768xf32, #tpu.memory_space<vmem>>, %arg7: memref<1x128x256xbf16, #tpu.memory_space<vmem>>, %arg8: memref<1x128x256xbf16, #tpu.memory_space<vmem>>, %arg9: memref<1x128x256xbf16, #tpu.memory_space<vmem>>) attributes {dimension_semantics = [#tpu.dimension_semantics<parallel>, #tpu.dimension_semantics<parallel>], iteration_bounds = array<i64: 2, 2>, scalar_prefetch = 0 : i64, scratch_operands = 0 : i64, tpu.core_type = #tpu.core_type<tc>, window_params = [{transform_indices = @transform_0, window_bounds = array<i64: 1, 128, 256>}, {pipeline_mode = #tpu.pipeline_mode<synchronous>, transform_indices = @transform_1, window_bounds = array<i64: 1, 256>}, {pipeline_mode = #tpu.pipeline_mode<synchronous>, transform_indices = @transform_2, window_bounds = array<i64: 1, 256>}, {pipeline_mode = #tpu.pipeline_mode<synchronous>, transform_indices = @transform_3, window_bounds = array<i64: 256, 768>}, {pipeline_mode = #tpu.pipeline_mode<synchronous>, transform_indices = @transform_4, window_bounds = array<i64: 1, 768>}, {transform_indices = @transform_5, window_bounds = array<i64: 1, 128, 256>}, {transform_indices = @transform_6, window_bounds = array<i64: 1, 128, 256>}, {transform_indices = @transform_7, window_bounds = array<i64: 1, 128, 256>}]} {
    %c0 = arith.constant 0 : index
    %c0_0 = arith.constant 0 : index
    %c0_1 = arith.constant 0 : index
    %0 = vector.load %arg2[%c0, %c0_0, %c0_1] : memref<1x128x256xf32, #tpu.memory_space<vmem>>, vector<1x128x256xf32>
    %1 = vector.shape_cast %0 : vector<1x128x256xf32> to vector<128x256xf32>
    %c0_2 = arith.constant 0 : index
    %c0_3 = arith.constant 0 : index
    %2 = vector.load %arg3[%c0_2, %c0_3] : memref<1x256xf32, #tpu.memory_space<vmem>>, vector<1x256xf32>
    %c0_4 = arith.constant 0 : index
    %c0_5 = arith.constant 0 : index
    %3 = vector.load %arg4[%c0_4, %c0_5] : memref<1x256xf32, #tpu.memory_space<vmem>>, vector<1x256xf32>
    %cst = arith.constant dense<0.000000e+00> : vector<128xf32>
    %4 = vector.multi_reduction <add>, %1, %cst [1] : vector<128x256xf32> to vector<128xf32>
    %5 = vector.shape_cast %4 : vector<128xf32> to vector<128x1xf32>
    %cst_6 = arith.constant 2.560000e+02 : f32
    %6 = vector.broadcast %cst_6 : f32 to vector<128x1xf32>
    %7 = arith.divf %5, %6 : vector<128x1xf32>
    %8 = vector.broadcast %7 : vector<128x1xf32> to vector<128x256xf32>
    %9 = arith.subf %1, %8 : vector<128x256xf32>
    %10 = arith.mulf %9, %9 : vector<128x256xf32>
    %cst_7 = arith.constant dense<0.000000e+00> : vector<128xf32>
    %11 = vector.multi_reduction <add>, %10, %cst_7 [1] : vector<128x256xf32> to vector<128xf32>
    %12 = vector.shape_cast %11 : vector<128xf32> to vector<128x1xf32>
    %cst_8 = arith.constant 2.560000e+02 : f32
    %13 = vector.broadcast %cst_8 : f32 to vector<128x1xf32>
    %14 = arith.divf %12, %13 : vector<128x1xf32>
    %15 = vector.broadcast %7 : vector<128x1xf32> to vector<128x256xf32>
    %16 = arith.subf %1, %15 : vector<128x256xf32>
    %cst_9 = arith.constant 9.99999974E-6 : f32
    %17 = vector.broadcast %cst_9 : f32 to vector<128x1xf32>
    %18 = arith.addf %14, %17 : vector<128x1xf32>
    %19 = math.rsqrt %18 : vector<128x1xf32>
    %20 = vector.broadcast %19 : vector<128x1xf32> to vector<128x256xf32>
    %21 = arith.mulf %16, %20 : vector<128x256xf32>
    %22 = vector.broadcast %2 : vector<1x256xf32> to vector<128x256xf32>
    %23 = arith.mulf %21, %22 : vector<128x256xf32>
    %24 = vector.broadcast %3 : vector<1x256xf32> to vector<128x256xf32>
    %25 = arith.addf %23, %24 : vector<128x256xf32>
    %26 = arith.truncf %25 : vector<128x256xf32> to vector<128x256xbf16>
    %c0_10 = arith.constant 0 : index
    %c0_11 = arith.constant 0 : index
    %27 = vector.load %arg5[%c0_10, %c0_11] : memref<256x768xbf16, #tpu.memory_space<vmem>>, vector<256x768xbf16>
    %cst_12 = arith.constant dense<0.000000e+00> : vector<128x768xf32>
    %28 = tpu.matmul %26, %27, %cst_12 {dimension_numbers = #tpu.dot_dimension_numbers<[1], [0], [0], [1], [0, 0, 1, 1], [], []>} : vector<128x256xbf16>, vector<256x768xbf16>, vector<128x768xf32> -> vector<128x768xf32>
    %c0_13 = arith.constant 0 : index
    %c0_14 = arith.constant 0 : index
    %29 = vector.load %arg6[%c0_13, %c0_14] : memref<1x768xf32, #tpu.memory_space<vmem>>, vector<1x768xf32>
    %30 = vector.broadcast %29 : vector<1x768xf32> to vector<128x768xf32>
    %31 = arith.addf %28, %30 : vector<128x768xf32>
    %32 = vector.extract_strided_slice %31 {offsets = [0, 0], sizes = [128, 256], strides = [1, 1]} : vector<128x768xf32> to vector<128x256xf32>
    %33 = arith.truncf %32 : vector<128x256xf32> to vector<128x256xbf16>
    %c0_15 = arith.constant 0 : index
    %c0_16 = arith.constant 0 : index
    %c0_17 = arith.constant 0 : index
    %34 = vector.load %arg7[%c0_15, %c0_16, %c0_17] : memref<1x128x256xbf16, #tpu.memory_space<vmem>>, vector<1x128x256xbf16>
    %35 = vector.shape_cast %34 : vector<1x128x256xbf16> to vector<128x256xbf16>
    %36 = vector.shape_cast %33 : vector<128x256xbf16> to vector<1x128x256xbf16>
    tpu.vector_store %arg7[%c0_15, %c0_16, %c0_17], %36 {strides = array<i32>} : memref<1x128x256xbf16, #tpu.memory_space<vmem>>, vector<1x128x256xbf16>,
    %37 = vector.extract_strided_slice %31 {offsets = [0, 256], sizes = [128, 256], strides = [1, 1]} : vector<128x768xf32> to vector<128x256xf32>
    %38 = arith.truncf %37 : vector<128x256xf32> to vector<128x256xbf16>
    %c0_18 = arith.constant 0 : index
    %c0_19 = arith.constant 0 : index
    %c0_20 = arith.constant 0 : index
    %39 = vector.load %arg8[%c0_18, %c0_19, %c0_20] : memref<1x128x256xbf16, #tpu.memory_space<vmem>>, vector<1x128x256xbf16>
    %40 = vector.shape_cast %39 : vector<1x128x256xbf16> to vector<128x256xbf16>
    %41 = vector.shape_cast %38 : vector<128x256xbf16> to vector<1x128x256xbf16>
    tpu.vector_store %arg8[%c0_18, %c0_19, %c0_20], %41 {strides = array<i32>} : memref<1x128x256xbf16, #tpu.memory_space<vmem>>, vector<1x128x256xbf16>,
    %42 = vector.extract_strided_slice %31 {offsets = [0, 512], sizes = [128, 256], strides = [1, 1]} : vector<128x768xf32> to vector<128x256xf32>
    %43 = arith.truncf %42 : vector<128x256xf32> to vector<128x256xbf16>
    %c0_21 = arith.constant 0 : index
    %c0_22 = arith.constant 0 : index
    %c0_23 = arith.constant 0 : index
    %44 = vector.load %arg9[%c0_21, %c0_22, %c0_23] : memref<1x128x256xbf16, #tpu.memory_space<vmem>>, vector<1x128x256xbf16>
    %45 = vector.shape_cast %44 : vector<1x128x256xbf16> to vector<128x256xbf16>
    %46 = vector.shape_cast %43 : vector<128x256xbf16> to vector<1x128x256xbf16>
    tpu.vector_store %arg9[%c0_21, %c0_22, %c0_23], %46 {strides = array<i32>} : memref<1x128x256xbf16, #tpu.memory_space<vmem>>, vector<1x128x256xbf16>,
    return
  }
  func.func @transform_0(%arg0: i32, %arg1: i32) -> (i32, i32, i32) {
    %c0_i32 = arith.constant 0 : i32
    %c0_i32_0 = arith.constant 0 : i32
    return %arg0, %arg1, %c0_i32 : i32, i32, i32
  }
  func.func @transform_1(%arg0: i32, %arg1: i32) -> (i32, i32) {
    %c0_i32 = arith.constant 0 : i32
    %c0_i32_0 = arith.constant 0 : i32
    %c0_i32_1 = arith.constant 0 : i32
    return %c0_i32, %c0_i32_0 : i32, i32
  }
  func.func @transform_2(%arg0: i32, %arg1: i32) -> (i32, i32) {
    %c0_i32 = arith.constant 0 : i32
    %c0_i32_0 = arith.constant 0 : i32
    %c0_i32_1 = arith.constant 0 : i32
    return %c0_i32, %c0_i32_0 : i32, i32
  }
  func.func @transform_3(%arg0: i32, %arg1: i32) -> (i32, i32) {
    %c0_i32 = arith.constant 0 : i32
    %c0_i32_0 = arith.constant 0 : i32
    %c0_i32_1 = arith.constant 0 : i32
    return %c0_i32, %c0_i32_0 : i32, i32
  }
  func.func @transform_4(%arg0: i32, %arg1: i32) -> (i32, i32) {
    %c0_i32 = arith.constant 0 : i32
    %c0_i32_0 = arith.constant 0 : i32
    %c0_i32_1 = arith.constant 0 : i32
    return %c0_i32, %c0_i32_0 : i32, i32
  }
  func.func @transform_5(%arg0: i32, %arg1: i32) -> (i32, i32, i32) {
    %c0_i32 = arith.constant 0 : i32
    %c0_i32_0 = arith.constant 0 : i32
    return %arg0, %arg1, %c0_i32 : i32, i32, i32
  }
  func.func @transform_6(%arg0: i32, %arg1: i32) -> (i32, i32, i32) {
    %c0_i32 = arith.constant 0 : i32
    %c0_i32_0 = arith.constant 0 : i32
    return %arg0, %arg1, %c0_i32 : i32, i32, i32
  }
  func.func @transform_7(%arg0: i32, %arg1: i32) -> (i32, i32, i32) {
    %c0_i32 = arith.constant 0 : i32
    %c0_i32_0 = arith.constant 0 : i32
    return %arg0, %arg1, %c0_i32 : i32, i32, i32
  }
}

</mosaic_0001>

<bundles_post_ra>
// kernel: tpu_custom_call.1
= control target key start
LH: loop header
LB: loop body
LE: loop exit
PB: predicated region body
PF: predicated region fallthrough
CT: control target
= control target key end

     0   :  { %s4330_s0 = inlined_call_operand.hbm [shape: f32[2,256,256], index: 0, kind: input, shape index: {}]   ;;  %s4331_s1 = inlined_call_operand.hbm [shape: f32[1,256], index: 1, kind: input, shape index: {}]   ;;  %s4332_s2 = inlined_call_operand.hbm [shape: f32[1,256], index: 2, kind: input, shape index: {}]   ;;  %s4333_s3 = inlined_call_operand.hbm [shape: bf16[256,768], index: 3, kind: input, shape index: {}]   ;;  %s4334_s4 = inlined_call_operand.hbm [shape: f32[1,768], index: 4, kind: input, shape index: {}]   ;;  %s4335_s5 = inlined_call_operand.hbm [shape: bf16[2,256,256], index: 5, kind: output, shape index: {0}]   ;;  %s4336_s6 = inlined_call_operand.hbm [shape: bf16[2,256,256], index: 6, kind: output, shape index: {1}]   ;;  %s4337_s7 = inlined_call_operand.hbm [shape: bf16[2,256,256], index: 7, kind: output, shape index: {2}]  }
   0x1   :  { %4347 = sst [smem:[#allocation23_spill]] %s4331_s1 }
   0x2   :  { %4348 = sst [smem:[#allocation24_spill]] %s4332_s2 }
   0x3   :  { %4349 = sst [smem:[#allocation25_spill]] %s4333_s3 }
   0x4   :  { %4350 = sst [smem:[#allocation26_spill]] %s4334_s4 }
   0x5   :  { %4351 = sst [smem:[#allocation27_spill]] %s4335_s5 }
   0x6   :  { %4352 = sst [smem:[#allocation28_spill]] %s4337_s7 }
   0x7   :  { %13 = vsyncpa [#allocation3], 0 }
   0x8   :  { %15 = vsyncpa [#allocation3 + $0x1], 0 }
   0x9   :  { %16 = vsyncpa [#allocation6], 0 }
   0xa   :  { %17 = vsyncpa [#allocation9], 0 }
   0xb   :  { %18 = vsyncpa [#allocation4], 0 }
   0xc   :  { %20 = vsyncpa [#allocation4 + $0x1], 0 }
   0xd   :  { %21 = vsyncpa [#allocation13], 0 }
   0xe   :  { %23 = vsyncpa [#allocation13 + $0x1], 0  ;;  %s3272_s24 = smov 0   ;;  %s3274_s25 = smov 0  }
   0xf   :  { %s3276_s26 = smov 0   ;;  %s3278_s27 = smov 0  }
  0x10   :  { %s3280_s28 = smov 0   ;;  %s3282_s29 = smov 0  }
  0x11   :  { %s3284_s30 = smov 0   ;;  %s3286_s8 = smov 0  }
  0x12 LB: > { %4353 = sst [smem:[#allocation20_spill]] %s3188_s24  ;;  %s3313_s9 = sadd.s32 4294967295, %s3216_s8   ;;  %s3216_s8 = sphi %s3286_s8, %s29_s8   ;;  %s3212_s30 = sphi %s3284_s30, %s4389_s30   ;;  %s3208_s29 = sphi %s3282_s29, %s4388_s29   ;;  %s3204_s28 = sphi %s3280_s28, %s4387_s28   ;;  %s3200_s27 = sphi %s3278_s27, %s4386_s27   ;;  %s3196_s26 = sphi %s3276_s26, %s4385_s26   ;;  %s3192_s25 = sphi %s3274_s25, %s4384_s25   ;;  %s3188_s24 = sphi %s3272_s24, %s4383_s24  }
  0x13   : > { %s4338_s10 = sadd.s32 4294967294, %s3216_s8   ;;  %p63_p0 = scmp.ne.s32.totalorder %s3192_s25, %s3188_s24 }
  0x14   : > { %p4340_p1 = scmp.eq.s32.totalorder %s3313_s9, 0  ;;  %p179_p3 = scmp.eq.s32.totalorder %s4338_s10, 3 }
  0x15   : > { %p2332_p5 = scmp.ge.s32.totalorder %s3216_s8, 1  ;;  %p242_p7 = scmp.lt.s32.totalorder %s3216_s8, 5 }
  0x16   : > { %p3324_p4 = por %p4340_p1, %p63_p0  ;;  %p3329_p6 = por %p179_p3, %p63_p0 }
  0x17   : > { %p3334_p8 = pnand %p2332_p5, %p242_p7  ;;  %s3218_s14 = smov [#allocation5]  }
  0x18   : > { %s4354_s11 = scalar_select %p3324_p4, 1, 0 }
  0x19   : > { %s4355_s12 = scalar_select %p3329_p6, 1, 0 }
  0x1a   : > { %s4357_s13 = scalar_select %p3334_p8, 1, 0 }
  0x1b   : > { %4356 = sst [smem:[#allocation21_spill]] %s4355_s12  ;;  %s255_s15 = sshll.u32 %s3218_s14, 4  ;;  %s256_s15 = int_to_ptr.vmem [resolvable:$true] %s255_s15 }
  0x1c   : > { %p2621_p9 = pneg %p3334_p8  ;;  %s3219_s16 = smov [#allocation8]  }
  0x1d   : > { %s276_s17 = sshll.u32 %s3219_s16, 4  ;;  %s3220_s19 = smov [#allocation7]   ;;  %s3346_s17 = int_to_ptr.vmem [resolvable:$true] %s276_s17 }
  0x1e   : > { %p3342_p10 = pnand %p2621_p9, %p4340_p1  ;;  %s3348_s20 = sshll.u32 %s3220_s19, 4  ;;  %s267_s20 = int_to_ptr.vmem [resolvable:$true] %s3348_s20 }
  0x1f   : > { %s4359_s1 = sld [smem:[#allocation23_spill]] }
  0x20   : > { %p3358_p12 = pneg %p3342_p10 }
  0x25   : > { %s2908_s23 = scalar_lea.hbm %s4359_s1, 32 }
  0x26   : > { %p2909_p11 = scmp.ne.s32.totalorder %s4359_s1, %s2908_s23  ;;  %p2915_p3 = scmp.lt.u32.totalorder %s2908_s23, %s4359_s1 }
  0x28   : > { %p2911_p13 = pnand %p3358_p12, %p2909_p11 }
  0x2a   : > { %p2912_p0 = pneg %p2911_p13 }
  0x2c   : > { %p2917_p5 = pnand %p2915_p3, %p2912_p0 }
  0x2e   : > { %2920 = shalt.err (!%p2917_p5)
}
  0x2f   : > { %s2921_s21 = scalar_lea.vmem %s256_s15, 32  ;;  %p2929_p2 = scmp.lt.s32.totalorder %s256_s15, %s256_s15 }
  0x30   : > { %p2922_p7 = scmp.ne.s32.totalorder %s256_s15, %s2921_s21  ;;  %p2930_p6 = scmp.lt.s32.totalorder %s2921_s21, %s2921_s21 }
  0x32   : > { %p2924_p9 = pnand %p2922_p7, %p3358_p12  ;;  %p2931_p4 = por %p2930_p6, %p2929_p2 }
  0x34   : > { %p2925_p1 = pneg %p2924_p9 }
  0x36   : > { %p2932_p8 = pnand %p2931_p4, %p2925_p1 }
  0x38   : > { %2935 = shalt.err (!%p2932_p8)
}
  0x39   : > { %2624 = dma.hbm_to_vmem [thread:$0]  (!%p3342_p10), %s4359_s1, 32, %s256_s15, [#allocation6]  }
  0x3a   : > { %s4361_s3 = sld [smem:[#allocation25_spill]] }
  0x40   : > { %s2936_s14 = scalar_lea.hbm %s4361_s3, 12288 }
  0x41   : > { %p2937_p11 = scmp.ne.s32.totalorder %s4361_s3, %s2936_s14  ;;  %p2943_p1 = scmp.lt.u32.totalorder %s2936_s14, %s4361_s3 }
  0x43   : > { %p2939_p13 = pnand %p2937_p11, %p3358_p12 }
  0x45   : > { %p2940_p2 = pneg %p2939_p13 }
  0x47   : > { %p2945_p4 = pnand %p2943_p1, %p2940_p2 }
  0x49   : > { %2948 = shalt.err (!%p2945_p4)
}
  0x4a   : > { %s2949_s15 = scalar_lea.vmem %s3346_s17, 12288  ;;  %p2957_p3 = scmp.lt.s32.totalorder %s3346_s17, %s3346_s17 }
  0x4b   : > { %p2950_p6 = scmp.ne.s32.totalorder %s3346_s17, %s2949_s15  ;;  %p2958_p5 = scmp.lt.s32.totalorder %s2949_s15, %s2949_s15 }
  0x4d   : > { %p2952_p8 = pnand %p2950_p6, %p3358_p12  ;;  %p2959_p7 = por %p2958_p5, %p2957_p3 }
  0x4f   : > { %p2953_p0 = pneg %p2952_p8 }
  0x51   : > { %p2960_p9 = pnand %p2959_p7, %p2953_p0 }
  0x53   : > { %2963 = shalt.err (!%p2960_p9)
}
  0x54   : > { %s3221_s24 = smov 384   ;;  %s3222_s7 = smov 24  }
  0x55   : > { %2630 = dma.hbm_to_vmem [thread:$0]  (!%p3342_p10), %s4361_s3, 12288, %s3346_s17, [#allocation9], %s3221_s24, %s3221_s24, %s3222_s7  }
  0x56   : > { %s4362_s2 = sld [smem:[#allocation24_spill]] }
  0x5c   : > { %s2964_s14 = scalar_lea.hbm %s4362_s2, 32 }
  0x5d   : > { %p2965_p11 = scmp.ne.s32.totalorder %s4362_s2, %s2964_s14  ;;  %p2971_p1 = scmp.lt.u32.totalorder %s2964_s14, %s4362_s2 }
  0x5f   : > { %p2967_p13 = pnand %p2965_p11, %p3358_p12 }
  0x61   : > { %p2968_p2 = pneg %p2967_p13 }
  0x63   : > { %p2973_p4 = pnand %p2971_p1, %p2968_p2 }
  0x65   : > { %2976 = shalt.err (!%p2973_p4)
}
  0x66   : > { %s2977_s10 = scalar_lea.vmem %s267_s20, 32  ;;  %p2985_p3 = scmp.lt.s32.totalorder %s267_s20, %s267_s20 }
  0x67   : > { %p2978_p6 = scmp.ne.s32.totalorder %s267_s20, %s2977_s10  ;;  %p2986_p5 = scmp.lt.s32.totalorder %s2977_s10, %s2977_s10 }
  0x69   : > { %p2980_p8 = pnand %p2978_p6, %p3358_p12  ;;  %p2987_p7 = por %p2986_p5, %p2985_p3 }
  0x6b   : > { %p2981_p0 = pneg %p2980_p8 }
  0x6d   : > { %p2988_p9 = pnand %p2987_p7, %p2981_p0 }
  0x6f   : > { %2991 = shalt.err (!%p2988_p9)
}
  0x70   : > { %2627 = dma.hbm_to_vmem [thread:$0]  (!%p3342_p10), %s4362_s2, 32, %s267_s20, [#allocation6]  }
  0x71   : > { %s3223_s1 = smov [#allocation10]   ;;  %s4363_s4 = sld [smem:[#allocation26_spill]] }
  0x72   : > { %s290_s7 = sshll.u32 %s3223_s1, 4  ;;  %s291_s7 = int_to_ptr.vmem [resolvable:$true] %s290_s7 }
  0x77   : > { %s2992_s23 = scalar_lea.hbm %s4363_s4, 96 }
  0x78   : > { %p2993_p11 = scmp.ne.s32.totalorder %s4363_s4, %s2992_s23  ;;  %p2999_p1 = scmp.lt.u32.totalorder %s2992_s23, %s4363_s4 }
  0x7a   : > { %p2995_p13 = pnand %p2993_p11, %p3358_p12 }
  0x7c   : > { %p2996_p2 = pneg %p2995_p13 }
  0x7e   : > { %p3001_p4 = pnand %p2999_p1, %p2996_p2 }
  0x80   : > { %3004 = shalt.err (!%p3001_p4)
}
  0x81   : > { %s3005_s20 = scalar_lea.vmem %s291_s7, 96  ;;  %p3013_p3 = scmp.lt.s32.totalorder %s291_s7, %s291_s7 }
  0x82   : > { %p3006_p6 = scmp.ne.s32.totalorder %s291_s7, %s3005_s20  ;;  %p3014_p5 = scmp.lt.s32.totalorder %s3005_s20, %s3005_s20 }
  0x84   : > { %p3008_p8 = pnand %p3006_p6, %p3358_p12  ;;  %p3015_p7 = por %p3014_p5, %p3013_p3 }
  0x86   : > { %p3009_p0 = pneg %p3008_p8 }
  0x88   : > { %p3016_p9 = pnand %p3015_p7, %p3009_p0 }
  0x8a   : > { %3019 = shalt.err (!%p3016_p9)
}
  0x8b   : > { %2633 = dma.hbm_to_vmem [thread:$0]  (!%p3342_p10), %s4363_s4, 96, %s291_s7, [#allocation9]  }
  0x8c   : > { %s38_s16 = sadd.s32 1, %s3208_s29  ;;  %s41_s24 = sadd.s32 1, %s3212_s30 }
  0x8d   : > { %p39_p12 = scmp.ge.s32.totalorder %s38_s16, 2  ;;  %s50_s18 = sadd.s32 1, %s3196_s26 }
  0x8e   : > { %p57_p11 = scmp.ne.s32.totalorder %s3196_s26, %s3192_s25  ;;  %p58_p13 = scmp.eq.s32.totalorder %s3216_s8, 0 }
  0x8f   : > { %s4391_s16 = smov (%p39_p12, %s38_s16), 0  ;;  %s4393_s24 = smov (!%p39_p12, %s41_s24), %s3212_s30 }
  0x90   : > { %4364 = sst [smem:[#allocation22_spill]] %s4391_s16  ;;  %s46_s1 = ssub.s32 %s3208_s29, %s4391_s16 }
  0x91   : > { %p3445_p2 = por %p58_p13, %p57_p11  ;;  %p43_p10 = scmp.ge.s32.totalorder %s4393_s24, 2 }
  0x92   : > { %p4366_p1 = scmp.eq.s32.totalorder %s3313_s9, 3  ;;  %p2652_p6 = scmp.lt.s32.totalorder %s3216_s8, 4 }
  0x93   : > { %s301_s12 = sand.u32 1, %s3196_s26   ;;  %s4395_s24 = smov (%p43_p10, %s4393_s24), 0 }
  0x94   : > { %p3451_p4 = por %p4366_p1, %p57_p11  ;;  %s2338_s23 = sshll.u32 %s301_s12, 8 }
  0x95   : > { %s45_s14 = ssub.s32 %s3212_s30, %s4395_s24  ;;  %s2513_s21 = sshll.u32 %s3208_s29, 5 }
  0x96   : > { %s47_s19 = sor.u32 %s46_s1, %s45_s14  ;;  %s2341_s15 = sshll.u32 %s3212_s30, 6 }
  0x97   : > { %p48_p8 = scmp.eq.s32.totalorder %s47_s19, 0  ;;  %s312_s20 = sadd.s32 %s2513_s21, %s2341_s15 }
  0x98   : > { %s305_s10 = scalar_lea.vmem [#allocation2], %s2338_s23  ;;  %s2342_s3 = sshll.u32 %s312_s20, 7 }
  0x99   : > { %s315_s17 = sshll.u32 %s305_s10, 4  ;;  %s3471_s5 = scalar_lea.hbm %s4330_s0, %s2342_s3  ;;  %s3466_s17 = int_to_ptr.vmem [resolvable:$true] %s315_s17 }
  0x9a   : > { %s3464_s2 = scalar_select %p48_p8, %s3196_s26, %s50_s18  }
  0x9b   : > { %p3477_p0 = pnand %p2652_p6, %p3445_p2  ;;  %s3481_s18 = scalar_lea.sflag [#allocation3], %s301_s12 }
  0x9c   : > { %s3020_s23 = scalar_lea.hbm %s3471_s5, 4096  ;;  %s3025_s16 = scalar_lea.hbm %s4330_s0, 16384 }
  0x9d   : > { %p3021_p3 = scmp.ne.s32.totalorder %s3471_s5, %s3020_s23  ;;  %p3022_p5 = pneg %p3477_p0 }
  0x9e   : > { %p3026_p12 = scmp.lt.u32.totalorder %s3471_s5, %s4330_s0  ;;  %p3027_p11 = scmp.lt.u32.totalorder %s3025_s16, %s3020_s23 }
  0x9f   : > { %p3023_p7 = pnand %p3022_p5, %p3021_p3  ;;  %p3029_p2 = scmp.lt.u32.totalorder %s3020_s23, %s3471_s5 }
  0xa0   : > { %p3028_p13 = por %p3027_p11, %p3026_p12 }
  0xa1   : > { %p3024_p9 = pneg %p3023_p7 }
  0xa2   : > { %p3030_p10 = por %p3029_p2, %p3028_p13 }
  0xa4   : > { %p3031_p1 = pnand %p3030_p10, %p3024_p9 }
  0xa6   : > { %3034 = shalt.err (!%p3031_p1)
}
  0xa7   : > { %s3035_s12 = scalar_lea.vmem %s3466_s17, 4096  ;;  %s3224_s19 = smov [#allocation2]  }
  0xa8   : > { %p3036_p6 = scmp.ne.s32.totalorder %s3466_s17, %s3035_s12  ;;  %s3040_s21 = sshll.u32 %s3224_s19, 4  ;;  %s3041_s21 = int_to_ptr.vmem [resolvable:$false] %s3040_s21 }
  0xa9   : > { %s3042_s15 = scalar_lea.vmem %s3041_s21, 8192  ;;  %p3043_p7 = scmp.lt.s32.totalorder %s3466_s17, %s3041_s21 }
  0xaa   : > { %p3038_p8 = pnand %p3036_p6, %p3022_p5  ;;  %p3044_p12 = scmp.lt.s32.totalorder %s3042_s15, %s3035_s12 }
  0xac   : > { %p3039_p3 = pneg %p3038_p8  ;;  %p3045_p11 = por %p3044_p12, %p3043_p7 }
  0xae   : > { %p3046_p13 = pnand %p3045_p11, %p3039_p3 }
  0xb0   : > { %3049 = shalt.err (!%p3046_p13)
}
  0xb1   : > { %s3225_s20 = smov 256   ;;  %s3226_s10 = smov 16  }
  0xb2   : > { %2637 = dma.hbm_to_vmem [thread:$0]  (!%p3477_p0), %s3471_s5, 4096, %s3466_s17, %s3481_s18, %s3225_s20, %s3225_s20, %s3226_s10  }
  0xb3   : > { %p4369_p5 = scmp.ne.s32.totalorder %s4357_s13, 0 }
  0xb4   : > { %s3512_s23 = sand.u32 (!%p4369_p5), 1, %s3192_s25   ;;  %p4370_p9 = scmp.ne.s32.totalorder (!%p4369_p5), %s4354_s11, 0 }
  0xb5   : > { %327 = sbr.rel (%p4369_p5) target bundleno = 869 (0x365), region = 40  ;;  %s2344_s3 = sshll.u32 (!%p4369_p5), %s3512_s23, 8 }
  0xb6   : > { %s330_s4 = scalar_lea.sflag (!%p4369_p5), [#allocation3], %s3512_s23  ;;  %s3516_s16 = scalar_lea.vmem (!%p4369_p5), [#allocation2], %s2344_s3 }
  0xbc   : > { %3167 = dma.done.wait (%p4370_p9), %s330_s4, 4096  }
  0xbd   : > { %3169 = vsyncadd (%p4370_p9), %s330_s4, 4294963200  ;;  %p4371_p0 = scmp.eq.s32.totalorder %s3313_s9, 0 }
  0xbf   : > { %3171 = dma.done.wait (%p4371_p0), [#allocation6], 64   ;;  %p4372_p2 = pmov %p4371_p0 }
  0xc0   : > { %p4373_p10 = pmov %p4371_p0 }
  0xc1   : > { %3173 = vsyncadd (%p4372_p2), [#allocation6], 4294967232 }
  0xc2   : > { %3175 = dma.done.wait (%p4373_p10), [#allocation9], 12384   ;;  %p4374_p1 = pmov %p4371_p0 }
  0xc3   : > { %v3531_v0 = vld [vmem:[%s3516_s16] sm:$0xff]  ;;  %v3534_v1 = vld [vmem:[%s3516_s16 + $0x8] sm:$0xff]  ;;  %v3545_v5 = vld [vmem:[%s3516_s16 + $0x10] sm:$0xff]  ;;  %s4018_s5 = sshll.u32 %s3512_s23, 7  ;;  %s2562_s17 = sshll.u32 %s3200_s27, 5 }
  0xc4   : > { %3177 = vsyncadd (%p4374_p1), [#allocation9], 4294954912  ;;  %v3537_v2 = vld [vmem:[%s3516_s16 + $0x20] sm:$0xff]  ;;  %v428_v3 = vadd.f32 %v3534_v1, %v3531_v0  ;;  %v3542_v4 = vld [vmem:[%s3516_s16 + $0x28] sm:$0xff]  ;;  %s4029_s11 = scalar_lea.vmem [#allocation11], %s4018_s5  ;;  %s4033_s13 = scalar_lea.vmem [#allocation12], %s4018_s5 }
  0xc5   : > { %v3548_v6 = vld [vmem:[%s3516_s16 + $0x18] sm:$0xff]  ;;  %v434_v7 = vadd.f32 %v3542_v4, %v3537_v2  ;;  %v3553_v8 = vld [vmem:[%s3516_s16 + $0x30] sm:$0xff]  ;;  %v3563_v12 = vld [vmem:[%s3516_s16 + $0x40] sm:$0xff]  ;;  %s2501_s1 = sshll.u32 %s3204_s28, 6  ;;  %s2075_s22 = sand.u32 1, %s3313_s9  }
  0xc6   : > { %v3556_v9 = vld [vmem:[%s3516_s16 + $0x38] sm:$0xff]  ;;  %429 = vadd.xlane.f32.xlu0 %v428_v3  ;;  %v431_v10 = vadd.f32 %v3548_v6, %v3545_v5  ;;  %v3566_v13 = vld [vmem:[%s3516_s16 + $0x48] sm:$0xff]  ;;  %v3569_v14 = vld [vmem:[%s3516_s16 + $0x50] sm:$0xff]  ;;  %s2094_s18 = sadd.s32 %s2562_s17, %s2501_s1  ;;  %s2116_s28 = sshll.u32 %s4033_s13, 4  ;;  %s4141_s28 = int_to_ptr.vmem [resolvable:$true] %s2116_s28 }
  0xc7   : > { %435 = vadd.xlane.f32.xlu1 %v434_v7  ;;  %v437_v11 = vadd.f32 %v3556_v9, %v3553_v8  ;;  %v3572_v15 = vld [vmem:[%s3516_s16 + $0x58] sm:$0xff]  ;;  %v440_v16 = vadd.f32 %v3566_v13, %v3563_v12  ;;  %v3579_v18 = vld [vmem:[%s3516_s16 + $0x60] sm:$0xff]  ;;  %v3582_v19 = vld [vmem:[%s3516_s16 + $0x68] sm:$0xff]  ;;  %s4119_s27 = sshll.u32 %s2094_s18, 6  ;;  %s2097_s14 = sshll.u32 %s4029_s11, 4  ;;  %s4149_s14 = int_to_ptr.vmem [resolvable:$true] %s2097_s14 }
  0xc8   : > { %v443_v17 = vadd.f32 %v3572_v15, %v3569_v14  ;;  %v3585_v20 = vld [vmem:[%s3516_s16 + $0x70] sm:$0xff]  ;;  %v3588_v21 = vld [vmem:[%s3516_s16 + $0x78] sm:$0xff]  ;;  %v3591_v22 = vld [vmem:[%s3516_s16 + $0x80] sm:$0xff]  ;;  %v446_v24 = vadd.f32 %v3582_v19, %v3579_v18  ;;  %s4134_s21 = scalar_lea.hbm %s4336_s6, %s4119_s27  ;;  %s4375_s10 = sld [smem:[#allocation27_spill]] }
  0xc9   : > { %v3594_v23 = vld [vmem:[%s3516_s16 + $0x88] sm:$0xff]  ;;  %v3599_v25 = vld [vmem:[%s3516_s16 + $0x90] sm:$0xff]  ;;  %v3602_v26 = vld [vmem:[%s3516_s16 + $0x98] sm:$0xff]  ;;  %v449_v27 = vadd.f32 %v3588_v21, %v3585_v20  ;;  %s4161_s4 = scalar_lea.sflag [#allocation13], %s2075_s22 }
  0xca   : > { %432 = vadd.xlane.f32.xlu0 %v431_v10  ;;  %v3607_v28 = vld [vmem:[%s3516_s16 + $0xa0] sm:$0xff]  ;;  %v3610_v29 = vld [vmem:[%s3516_s16 + $0xa8] sm:$0xff]  ;;  %v452_v30 = vadd.f32 %v3594_v23, %v3591_v22  ;;  %v3615_v31 = vld [vmem:[%s3516_s16 + $0xb0] sm:$0xff]  ;;  %v455_v33 = vadd.f32 %v3602_v26, %v3599_v25 }
  0xcb   : > { %438 = vadd.xlane.f32.xlu1 %v437_v11  ;;  %v3618_v32 = vld [vmem:[%s3516_s16 + $0xb8] sm:$0xff]  ;;  %v3623_v34 = vld [vmem:[%s3516_s16 + $0xc0] sm:$0xff]  ;;  %v3626_v35 = vld [vmem:[%s3516_s16 + $0xc8] sm:$0xff]  ;;  %v458_v36 = vadd.f32 %v3610_v29, %v3607_v28 }
  0xcc   : > { %v3631_v37 = vld [vmem:[%s3516_s16 + $0xd0] sm:$0xff]  ;;  %v3634_v38 = vld [vmem:[%s3516_s16 + $0xd8] sm:$0xff]  ;;  %v461_v39 = vadd.f32 %v3618_v32, %v3615_v31  ;;  %v3639_v40 = vld [vmem:[%s3516_s16 + $0xe0] sm:$0xff]  ;;  %v464_v42 = vadd.f32 %v3626_v35, %v3623_v34 }
  0xcd   : > { %v3642_v41 = vld [vmem:[%s3516_s16 + $0xe8] sm:$0xff]  ;;  %v3647_v43 = vld [vmem:[%s3516_s16 + $0xf0] sm:$0xff]  ;;  %v3650_v44 = vld [vmem:[%s3516_s16 + $0xf8] sm:$0xff]  ;;  %v467_v45 = vadd.f32 %v3634_v38, %v3631_v37  ;;  %s3050_s16 = scalar_lea.vmem %s4141_s28, 2048 }
  0xce   : > { %441 = vadd.xlane.f32.xlu0 %v440_v16  ;;  %v470_v46 = vadd.f32 %v3642_v41, %v3639_v40  ;;  %v473_v47 = vadd.f32 %v3650_v44, %v3647_v43  ;;  %v2732_v48 = vld [vmem:[#allocation8 + $0x4] ss:$24 sps:$4 sm:$0xff]   ;;  %v2736_v50 = vld [vmem:[#allocation8] ss:$24 sps:$4 sm:$0xff]   ;;  %v2738_v52 = vld [vmem:[#allocation8 + $0x34] ss:$24 sps:$4 sm:$0xff]   ;;  %s4147_s3 = scalar_lea.hbm %s4375_s10, %s4119_s27  ;;  %p3051_p6 = scmp.ne.s32.totalorder %s4141_s28, %s3050_s16 }
  0xcf   : > { %444 = vadd.xlane.f32.xlu1 %v443_v17  ;;  %v2734_v49 = vld [vmem:[#allocation8 + $0xc] ss:$24 sps:$4 sm:$0xff]   ;;  %v2737_v51 = vld [vmem:[#allocation8 + $0x8] ss:$24 sps:$4 sm:$0xff]   ;;  %v2740_v53 = vld [vmem:[#allocation8 + $0x3c] ss:$24 sps:$4 sm:$0xff]   ;;  %1395 = vmatprep.subr.bf16.mxu0 %v2732_v48 }
  0xd0   : > { %1508 = vmatprep.subr.bf16.mxu1 %v2734_v49  ;;  %1396 = vmatpush1.bf16.msra.mxu0 %v2736_v50  ;;  %v2742_v54 = vld [vmem:[#allocation8 + $0x30] ss:$24 sps:$4 sm:$0xff]   ;;  %v2744_v56 = vld [vmem:[#allocation8 + $0x64] ss:$24 sps:$4 sm:$0xff]   ;;  %v2748_v58 = vld [vmem:[#allocation8 + $0x60] ss:$24 sps:$4 sm:$0xff]   ;;  %p3052_p8 = pnand %p3051_p6, %p3451_p4 }
  0xd1   : > { %1509 = vmatpush1.bf16.msra.mxu1 %v2737_v51  ;;  %v2743_v55 = vld [vmem:[#allocation8 + $0x38] ss:$24 sps:$4 sm:$0xff]   ;;  %1397 = vmatprep.subr.bf16.mxu0 %v2738_v52  ;;  %v2746_v57 = vld [vmem:[#allocation8 + $0x6c] ss:$24 sps:$4 sm:$0xff]   ;;  %v2749_v59 = vld [vmem:[#allocation8 + $0x68] ss:$24 sps:$4 sm:$0xff]  }
  0xd2   : > { %447 = vadd.xlane.f32.xlu0 %v446_v24  ;;  %1510 = vmatprep.subr.bf16.mxu1 %v2740_v53  ;;  %v2750_v60 = vld [vmem:[#allocation8 + $0x94] ss:$24 sps:$4 sm:$0xff]   ;;  %v2754_v62 = vld [vmem:[#allocation8 + $0x90] ss:$24 sps:$4 sm:$0xff]   ;;  %v2756_v3 = vld [vmem:[#allocation8 + $0xc4] ss:$24 sps:$4 sm:$0xff]   ;;  %p3053_p3 = pneg %p3052_p8 }
  0xd3   : > { %450 = vadd.xlane.f32.xlu1 %v449_v27  ;;  %v2752_v61 = vld [vmem:[#allocation8 + $0x9c] ss:$24 sps:$4 sm:$0xff]   ;;  %v2755_v63 = vld [vmem:[#allocation8 + $0x98] ss:$24 sps:$4 sm:$0xff]   ;;  %v2758_v7 = vld [vmem:[#allocation8 + $0xcc] ss:$24 sps:$4 sm:$0xff]  }
  0xd4   : > { %1398 = vmatpush1.bf16.msra.mxu0 %v2742_v54  ;;  %v2760_v10 = vld [vmem:[#allocation8 + $0xc0] ss:$24 sps:$4 sm:$0xff]   ;;  %v2762_v16 = vld [vmem:[#allocation8 + $0xf4] ss:$24 sps:$4 sm:$0xff]   ;;  %v2766_v24 = vld [vmem:[#allocation8 + $0xf0] ss:$24 sps:$4 sm:$0xff]  }
  0xd5   : > { %1511 = vmatpush1.bf16.msra.mxu1 %v2743_v55  ;;  %1399 = vmatprep.subr.bf16.mxu0 %v2744_v56  ;;  %v2761_v11 = vld [vmem:[#allocation8 + $0xc8] ss:$24 sps:$4 sm:$0xff]   ;;  %v2764_v17 = vld [vmem:[#allocation8 + $0xfc] ss:$24 sps:$4 sm:$0xff]   ;;  %v2767_v27 = vld [vmem:[#allocation8 + $0xf8] ss:$24 sps:$4 sm:$0xff]  }
  0xd6   : > { %453 = vadd.xlane.f32.xlu0 %v452_v30  ;;  %1512 = vmatprep.subr.bf16.mxu1 %v2746_v57  ;;  %v2768_v30 = vld [vmem:[#allocation8 + $0x124] ss:$24 sps:$4 sm:$0xff]   ;;  %v2784_v50 = vld [vmem:[#allocation8 + $0x180] ss:$24 sps:$4 sm:$0xff]   ;;  %v2786_v52 = vld [vmem:[#allocation8 + $0x1b4] ss:$24 sps:$4 sm:$0xff]  }
  0xd7   : > { %456 = vadd.xlane.f32.xlu1 %v455_v33  ;;  %v2770_v33 = vld [vmem:[#allocation8 + $0x12c] ss:$24 sps:$4 sm:$0xff]   ;;  %v2785_v51 = vld [vmem:[#allocation8 + $0x188] ss:$24 sps:$4 sm:$0xff]   ;;  %v2788_v53 = vld [vmem:[#allocation8 + $0x1bc] ss:$24 sps:$4 sm:$0xff]  }
  0xd8   : > { %1400 = vmatpush1.bf16.msra.mxu0 %v2748_v58  ;;  %v2780_v48 = vld [vmem:[#allocation8 + $0x184] ss:$24 sps:$4 sm:$0xff]  }
  0xd9   : > { %1513 = vmatpush1.bf16.msra.mxu1 %v2749_v59  ;;  %1401 = vmatprep.subr.bf16.mxu0 %v2750_v60  ;;  %v2782_v49 = vld [vmem:[#allocation8 + $0x18c] ss:$24 sps:$4 sm:$0xff]  }
  0xda   : > { %459 = vadd.xlane.f32.xlu0 %v458_v36  ;;  %1514 = vmatprep.subr.bf16.mxu1 %v2752_v61  ;;  %v2772_v36 = vld [vmem:[#allocation8 + $0x120] ss:$24 sps:$4 sm:$0xff]  }
  0xdb   : > { %462 = vadd.xlane.f32.xlu1 %v461_v39  ;;  %v2773_v39 = vld [vmem:[#allocation8 + $0x128] ss:$24 sps:$4 sm:$0xff]  }
  0xdc   : > { %1402 = vmatpush1.bf16.msra.mxu0 %v2754_v62 }
  0xdd   : > { %1515 = vmatpush1.bf16.msra.mxu1 %v2755_v63  ;;  %1403 = vmatprep.subr.bf16.mxu0 %v2756_v3 }
  0xde   : > { %465 = vadd.xlane.f32.xlu0 %v464_v42  ;;  %1516 = vmatprep.subr.bf16.mxu1 %v2758_v7  ;;  %v2774_v42 = vld [vmem:[#allocation8 + $0x154] ss:$24 sps:$4 sm:$0xff]  }
  0xdf   : > { %468 = vadd.xlane.f32.xlu1 %v467_v45  ;;  %v2776_v45 = vld [vmem:[#allocation8 + $0x15c] ss:$24 sps:$4 sm:$0xff]  }
  0xe0   : > { %1404 = vmatpush1.bf16.msra.mxu0 %v2760_v10 }
  0xe1   : > { %1517 = vmatpush1.bf16.msra.mxu1 %v2761_v11  ;;  %1405 = vmatprep.subr.bf16.mxu0 %v2762_v16 }
  0xe2   : > { %471 = vadd.xlane.f32.xlu0 %v470_v46  ;;  %1518 = vmatprep.subr.bf16.mxu1 %v2764_v17  ;;  %v2778_v46 = vld [vmem:[#allocation8 + $0x150] ss:$24 sps:$4 sm:$0xff]  }
  0xe3   : > { %474 = vadd.xlane.f32.xlu1 %v473_v47  ;;  %v2779_v47 = vld [vmem:[#allocation8 + $0x158] ss:$24 sps:$4 sm:$0xff]  }
  0xe4   : > { %1406 = vmatpush1.bf16.msra.mxu0 %v2766_v24 }
  0xe5   : > { %1519 = vmatpush1.bf16.msra.mxu1 %v2767_v27  ;;  %1407 = vmatprep.subr.bf16.mxu0 %v2768_v30 }
  0xe6   : > { %1520 = vmatprep.subr.bf16.mxu1 %v2770_v33 }
  0xe8   : > { %1408 = vmatpush1.bf16.msra.mxu0 %v2772_v36 }
  0xe9   : > { %1521 = vmatpush1.bf16.msra.mxu1 %v2773_v39  ;;  %1409 = vmatprep.subr.bf16.mxu0 %v2774_v42 }
  0xea   : > { %1522 = vmatprep.subr.bf16.mxu1 %v2776_v45 }
  0xec   : > { %1410 = vmatpush1.bf16.msra.mxu0 %v2778_v46 }
  0xed   : > { %1523 = vmatpush1.bf16.msra.mxu1 %v2779_v47  ;;  %1411 = vmatprep.subr.bf16.mxu0 %v2780_v48 }
  0xee   : > { %1524 = vmatprep.subr.bf16.mxu1 %v2782_v49 }
  0xf0   : > { %1412 = vmatpush1.bf16.msra.mxu0 %v2784_v50 }
  0xf1   : > { %1525 = vmatpush1.bf16.msra.mxu1 %v2785_v51  ;;  %1413 = vmatprep.subr.bf16.mxu0 %v2786_v52 }
  0xf2   : > { %1526 = vmatprep.subr.bf16.mxu1 %v2788_v53 }
 0x153   : > { %v430_v54 = vpop.xlane.xlu0 %429 }
 0x154   : > { %v477_v55 = vmul.f32 0.00390625, %v430_v54  ;;  %v436_v56 = vpop.xlane.xlu1 %435 }
 0x155   : > { %v479_v57 = vmul.f32 0.00390625, %v436_v56 }
 0x156   : > { %v3659_v58 = vsub.f32 %v3531_v0, %v477_v55  ;;  %v3662_v59 = vsub.f32 %v3534_v1, %v477_v55 }
 0x157   : > { %v3665_v60 = vsub.f32 %v3537_v2, %v479_v57  ;;  %v3668_v61 = vsub.f32 %v3542_v4, %v479_v57  ;;  %v433_v62 = vpop.xlane.xlu0 %432 }
 0x158   : > { %v478_v63 = vmul.f32 0.00390625, %v433_v62  ;;  %v439_v3 = vpop.xlane.xlu1 %438  ;;  %v525_v7 = vmul.f32 %v3659_v58, %v3659_v58  ;;  %v526_v10 = vmul.f32 %v3662_v59, %v3662_v59 }
 0x159   : > { %v480_v0 = vmul.f32 0.00390625, %v439_v3  ;;  %v529_v1 = vmul.f32 %v3665_v60, %v3665_v60  ;;  %v530_v2 = vmul.f32 %v3668_v61, %v3668_v61 }
 0x15a   : > { %v3679_v11 = vsub.f32 %v3545_v5, %v478_v63  ;;  %v3682_v4 = vsub.f32 %v3548_v6, %v478_v63  ;;  %v557_v16 = vadd.f32 %v526_v10, %v525_v7 }
 0x15b   : > { %v3685_v17 = vsub.f32 %v3553_v8, %v480_v0  ;;  %v3688_v24 = vsub.f32 %v3556_v9, %v480_v0  ;;  %v442_v27 = vpop.xlane.xlu0 %441  ;;  %v563_v36 = vadd.f32 %v530_v2, %v529_v1 }
 0x15c   : > { %v481_v30 = vmul.f32 0.00390625, %v442_v27  ;;  %558 = vadd.xlane.f32.xlu0 %v557_v16  ;;  %v445_v33 = vpop.xlane.xlu1 %444  ;;  %v527_v39 = vmul.f32 %v3679_v11, %v3679_v11  ;;  %v528_v5 = vmul.f32 %v3682_v4, %v3682_v4 }
 0x15d   : > { %v482_v6 = vmul.f32 0.00390625, %v445_v33  ;;  %v531_v42 = vmul.f32 %v3685_v17, %v3685_v17  ;;  %v532_v8 = vmul.f32 %v3688_v24, %v3688_v24 }
 0x15e   : > { %v3699_v9 = vsub.f32 %v3563_v12, %v481_v30  ;;  %v3702_v45 = vsub.f32 %v3566_v13, %v481_v30  ;;  %v560_v46 = vadd.f32 %v528_v5, %v527_v39 }
 0x15f   : > { %v3705_v47 = vsub.f32 %v3569_v14, %v482_v6  ;;  %v3708_v48 = vsub.f32 %v3572_v15, %v482_v6  ;;  %v448_v49 = vpop.xlane.xlu0 %447  ;;  %v566_v52 = vadd.f32 %v532_v8, %v531_v42  ;;  %v2790_v42 = vld [vmem:[#allocation8 + $0x1b0] ss:$24 sps:$4 sm:$0xff]  }
 0x160   : > { %v483_v50 = vmul.f32 0.00390625, %v448_v49  ;;  %564 = vadd.xlane.f32.xlu0 %v563_v36  ;;  %561 = vadd.xlane.f32.xlu1 %v560_v46  ;;  %v451_v51 = vpop.xlane.xlu1 %450  ;;  %v533_v12 = vmul.f32 %v3699_v9, %v3699_v9  ;;  %v534_v13 = vmul.f32 %v3702_v45, %v3702_v45  ;;  %v2791_v8 = vld [vmem:[#allocation8 + $0x1b8] ss:$24 sps:$4 sm:$0xff]  }
 0x161   : > { %v484_v53 = vmul.f32 0.00390625, %v451_v51  ;;  %v535_v14 = vmul.f32 %v3705_v47, %v3705_v47  ;;  %v536_v15 = vmul.f32 %v3708_v48, %v3708_v48  ;;  %1414 = vmatpush1.bf16.msra.mxu0 %v2790_v42  ;;  %1527 = vmatpush1.bf16.msra.mxu1 %v2791_v8  ;;  %v2803_v42 = vld [vmem:[#allocation8 + $0x218] ss:$24 sps:$4 sm:$0xff]  }
 0x162   : > { %v3719_v54 = vsub.f32 %v3579_v18, %v483_v50  ;;  %v3722_v55 = vsub.f32 %v3582_v19, %v483_v50  ;;  %v569_v56 = vadd.f32 %v534_v13, %v533_v12 }
 0x163   : > { %v3725_v57 = vsub.f32 %v3585_v20, %v484_v53  ;;  %v3728_v62 = vsub.f32 %v3588_v21, %v484_v53  ;;  %v454_v63 = vpop.xlane.xlu0 %453  ;;  %v572_v10 = vadd.f32 %v536_v15, %v535_v14  ;;  %v2792_v15 = vld [vmem:[#allocation8 + $0x1e4] ss:$24 sps:$4 sm:$0xff]  }
 0x164   : > { %v485_v3 = vmul.f32 0.00390625, %v454_v63  ;;  %567 = vadd.xlane.f32.xlu1 %v566_v52  ;;  %570 = vadd.xlane.f32.xlu0 %v569_v56  ;;  %v457_v7 = vpop.xlane.xlu1 %456  ;;  %v537_v18 = vmul.f32 %v3719_v54, %v3719_v54  ;;  %v538_v19 = vmul.f32 %v3722_v55, %v3722_v55 }
 0x165   : > { %v486_v0 = vmul.f32 0.00390625, %v457_v7  ;;  %v539_v20 = vmul.f32 %v3725_v57, %v3725_v57  ;;  %v540_v21 = vmul.f32 %v3728_v62, %v3728_v62  ;;  %1415 = vmatprep.subr.bf16.mxu0 %v2792_v15 }
 0x166   : > { %v3739_v1 = vsub.f32 %v3591_v22, %v485_v3  ;;  %v3742_v2 = vsub.f32 %v3594_v23, %v485_v3  ;;  %v575_v16 = vadd.f32 %v538_v19, %v537_v18  ;;  %v2796_v18 = vld [vmem:[#allocation8 + $0x1e0] ss:$24 sps:$4 sm:$0xff]  }
 0x167   : > { %v3745_v27 = vsub.f32 %v3599_v25, %v486_v0  ;;  %v3748_v30 = vsub.f32 %v3602_v26, %v486_v0  ;;  %v460_v33 = vpop.xlane.xlu0 %459  ;;  %v578_v5 = vadd.f32 %v540_v21, %v539_v20  ;;  %v2797_v19 = vld [vmem:[#allocation8 + $0x1e8] ss:$24 sps:$4 sm:$0xff]   ;;  %1416 = vmatpush1.bf16.msra.mxu0 %v2796_v18  ;;  %v2818_v18 = vld [vmem:[#allocation8 + $0x2ac] ss:$24 sps:$4 sm:$0xff]  }
 0x168   : > { %v487_v36 = vmul.f32 0.00390625, %v460_v33  ;;  %573 = vadd.xlane.f32.xlu1 %v572_v10  ;;  %576 = vadd.xlane.f32.xlu0 %v575_v16  ;;  %v463_v39 = vpop.xlane.xlu1 %462  ;;  %v541_v22 = vmul.f32 %v3739_v1, %v3739_v1  ;;  %v542_v23 = vmul.f32 %v3742_v2, %v3742_v2 }
 0x169   : > { %v488_v6 = vmul.f32 0.00390625, %v463_v39  ;;  %v543_v25 = vmul.f32 %v3745_v27, %v3745_v27  ;;  %v544_v26 = vmul.f32 %v3748_v30, %v3748_v30 }
 0x16a   : > { %v3759_v46 = vsub.f32 %v3607_v28, %v487_v36  ;;  %v3762_v49 = vsub.f32 %v3610_v29, %v487_v36  ;;  %v581_v50 = vadd.f32 %v542_v23, %v541_v22  ;;  %v2800_v22 = vld [vmem:[#allocation8 + $0x21c] ss:$24 sps:$4 sm:$0xff]  }
 0x16b   : > { %v3765_v51 = vsub.f32 %v3615_v31, %v488_v6  ;;  %v3768_v52 = vsub.f32 %v3618_v32, %v488_v6  ;;  %v466_v12 = vpop.xlane.xlu0 %465  ;;  %v584_v14 = vadd.f32 %v544_v26, %v543_v25  ;;  %v2794_v31 = vld [vmem:[#allocation8 + $0x1ec] ss:$24 sps:$4 sm:$0xff]   ;;  %v2802_v26 = vld [vmem:[#allocation8 + $0x210] ss:$24 sps:$4 sm:$0xff]  }
 0x16c   : > { %v489_v13 = vmul.f32 0.00390625, %v466_v12  ;;  %579 = vadd.xlane.f32.xlu1 %v578_v5  ;;  %582 = vadd.xlane.f32.xlu0 %v581_v50  ;;  %v469_v53 = vpop.xlane.xlu1 %468  ;;  %v545_v28 = vmul.f32 %v3759_v46, %v3759_v46  ;;  %v546_v29 = vmul.f32 %v3762_v49, %v3762_v49  ;;  %v2798_v5 = vld [vmem:[#allocation8 + $0x214] ss:$24 sps:$4 sm:$0xff]  }
 0x16d   : > { %v490_v56 = vmul.f32 0.00390625, %v469_v53  ;;  %v547_v32 = vmul.f32 %v3765_v51, %v3765_v51  ;;  %v548_v63 = vmul.f32 %v3768_v52, %v3768_v52  ;;  %1528 = vmatprep.subr.bf16.mxu1 %v2794_v31  ;;  %1417 = vmatprep.subr.bf16.mxu0 %v2798_v5  ;;  %v2806_v53 = vld [vmem:[#allocation8 + $0x24c] ss:$24 sps:$4 sm:$0xff]  }
 0x16e   : > { %v3779_v3 = vsub.f32 %v3623_v34, %v489_v13  ;;  %v3782_v7 = vsub.f32 %v3626_v35, %v489_v13  ;;  %v587_v10 = vadd.f32 %v546_v29, %v545_v28  ;;  %1529 = vmatpush1.bf16.msra.mxu1 %v2797_v19  ;;  %1418 = vmatpush1.bf16.msra.mxu0 %v2802_v26  ;;  %v2808_v28 = vld [vmem:[#allocation8 + $0x240] ss:$24 sps:$4 sm:$0xff]   ;;  %v2810_v31 = vld [vmem:[#allocation8 + $0x274] ss:$24 sps:$4 sm:$0xff]  }
 0x16f   : > { %v3785_v0 = vsub.f32 %v3631_v37, %v490_v56  ;;  %v3788_v20 = vsub.f32 %v3634_v38, %v490_v56  ;;  %v472_v21 = vpop.xlane.xlu0 %471  ;;  %v590_v33 = vadd.f32 %v548_v63, %v547_v32  ;;  %1530 = vmatprep.subr.bf16.mxu1 %v2800_v22  ;;  %v2809_v29 = vld [vmem:[#allocation8 + $0x248] ss:$24 sps:$4 sm:$0xff]   ;;  %v2812_v56 = vld [vmem:[#allocation8 + $0x27c] ss:$24 sps:$4 sm:$0xff]   ;;  %v2815_v63 = vld [vmem:[#allocation8 + $0x278] ss:$24 sps:$4 sm:$0xff]  }
 0x170   : > { %v491_v16 = vmul.f32 0.00390625, %v472_v21  ;;  %585 = vadd.xlane.f32.xlu1 %v584_v14  ;;  %588 = vadd.xlane.f32.xlu0 %v587_v10  ;;  %v475_v34 = vpop.xlane.xlu1 %474  ;;  %v549_v35 = vmul.f32 %v3779_v3, %v3779_v3  ;;  %v550_v36 = vmul.f32 %v3782_v7, %v3782_v7  ;;  %v2814_v32 = vld [vmem:[#allocation8 + $0x270] ss:$24 sps:$4 sm:$0xff]   ;;  %v2816_v10 = vld [vmem:[#allocation8 + $0x2a4] ss:$24 sps:$4 sm:$0xff]  }
 0x171   : > { %v492_v39 = vmul.f32 0.00390625, %v475_v34  ;;  %v551_v37 = vmul.f32 %v3785_v0, %v3785_v0  ;;  %v552_v38 = vmul.f32 %v3788_v20, %v3788_v20  ;;  %v2820_v19 = vld [vmem:[#allocation8 + $0x2a0] ss:$24 sps:$4 sm:$0xff]   ;;  %v2824_v34 = vld [vmem:[#allocation8 + $0x2dc] ss:$24 sps:$4 sm:$0xff]  }
 0x172   : > { %v3799_v23 = vsub.f32 %v3639_v40, %v491_v16  ;;  %v3802_v6 = vsub.f32 %v3642_v41, %v491_v16  ;;  %v593_v25 = vadd.f32 %v550_v36, %v549_v35  ;;  %1531 = vmatpush1.bf16.msra.mxu1 %v2803_v42  ;;  %v2821_v21 = vld [vmem:[#allocation8 + $0x2a8] ss:$24 sps:$4 sm:$0xff]   ;;  %v2822_v16 = vld [vmem:[#allocation8 + $0x2d4] ss:$24 sps:$4 sm:$0xff]   ;;  %v2827_v35 = vld [vmem:[#allocation8 + $0x2d8] ss:$24 sps:$4 sm:$0xff]  }
 0x173   : > { %v3805_v8 = vsub.f32 %v3647_v43, %v492_v39  ;;  %v3808_v50 = vsub.f32 %v3650_v44, %v492_v39  ;;  %v596_v12 = vadd.f32 %v552_v38, %v551_v37  ;;  %v2804_v44 = vld [vmem:[#allocation8 + $0x244] ss:$24 sps:$4 sm:$0xff]   ;;  %1532 = vmatprep.subr.bf16.mxu1 %v2806_v53  ;;  %v2830_v36 = vld [vmem:[#allocation8 + $0x14] ss:$24 sps:$4 sm:$0xff]   ;;  %v686_v38 = vlaneseq }
 0x174   : > { %591 = vadd.xlane.f32.xlu1 %v590_v33  ;;  %594 = vadd.xlane.f32.xlu0 %v593_v25  ;;  %v553_v40 = vmul.f32 %v3799_v23, %v3799_v23  ;;  %v554_v41 = vmul.f32 %v3802_v6, %v3802_v6  ;;  %v2826_v33 = vld [vmem:[#allocation8 + $0x2d0] ss:$24 sps:$4 sm:$0xff]  }
 0x175   : > { %v555_v13 = vmul.f32 %v3805_v8, %v3805_v8  ;;  %v556_v43 = vmul.f32 %v3808_v50, %v3808_v50  ;;  %1419 = vmatprep.subr.bf16.mxu0 %v2804_v44 }
 0x176   : > { %v599_v14 = vadd.f32 %v554_v41, %v553_v40  ;;  %1420 = vmatpush1.bf16.msra.mxu0 %v2808_v28  ;;  %1533 = vmatpush1.bf16.msra.mxu1 %v2809_v29 }
 0x177   : > { %v602_v15 = vadd.f32 %v556_v43, %v555_v13  ;;  %1421 = vmatprep.subr.bf16.mxu0 %v2810_v31  ;;  %1534 = vmatprep.subr.bf16.mxu1 %v2812_v56  ;;  %v426_v31 = vld [vmem:[#allocation5] sm:$0x3] }
 0x178   : > { %597 = vadd.xlane.f32.xlu1 %v596_v12  ;;  %600 = vadd.xlane.f32.xlu0 %v599_v14  ;;  %v3818_v12 = vshrl.u32 %v686_v38, 7 }
 0x17a   : > { %1422 = vmatpush1.bf16.msra.mxu0 %v2814_v32  ;;  %1535 = vmatpush1.bf16.msra.mxu1 %v2815_v63  ;;  %v3821_v14 = vsub.s32 1, %v3818_v12  ;;  %v3824_v28 = vsub.s32 0, %v3818_v12 }
 0x17b   : > { %1423 = vmatprep.subr.bf16.mxu0 %v2816_v10  ;;  %1536 = vmatprep.subr.bf16.mxu1 %v2818_v18 }
 0x17c   : > { %603 = vadd.xlane.f32.xlu1 %v602_v15  ;;  %v3827_v18 = vrot.slane %v426_v31, %v3821_v14 }
 0x17e   : > { %1424 = vmatpush1.bf16.msra.mxu0 %v2820_v19  ;;  %1537 = vmatpush1.bf16.msra.mxu1 %v2821_v21 }
 0x17f   : > { %1425 = vmatprep.subr.bf16.mxu0 %v2822_v16  ;;  %1538 = vmatprep.subr.bf16.mxu1 %v2824_v34  ;;  %v427_v16 = vld [vmem:[#allocation7] sm:$0x3]  ;;  %v3830_v34 = vrot.slane %v426_v31, %v3824_v28 }
 0x182   : > { %1426 = vmatpush1.bf16.msra.mxu0 %v2826_v33  ;;  %1539 = vmatpush1.bf16.msra.mxu1 %v2827_v35 }
 0x183   : > { %1621 = vmatprep.subr.bf16.mxu0 %v2830_v36  ;;  %2565 = vmatprep.subr.bf16.mxu1 %v2830_v36 }
 0x1e9   : > { %v559_v39 = vpop.xlane.xlu0 %558 }
 0x1ea   : > { %v605_v37 = vmul.f32 0.00390625, %v559_v39 }
 0x1ec   : > { %v621_v5 = vadd.f32 1e-05, %v605_v37 }
 0x1ed   : > { %v562_v22 = vpop.xlane.xlu1 %561  ;;  %v565_v25 = vpop.xlane.xlu0 %564 }
 0x1ee   : > { %2876 = vrsqrt.f32 %v621_v5  ;;  %v606_v26 = vmul.f32 0.00390625, %v562_v22  ;;  %v607_v42 = vmul.f32 0.00390625, %v565_v25  ;;  %v3836_v22 = vrot.slane %v427_v16, %v3821_v14 }
 0x1f0   : > { %v622_v40 = vadd.f32 1e-05, %v606_v26  ;;  %v623_v41 = vadd.f32 1e-05, %v607_v42 }
 0x1f1   : > { %v568_v13 = vpop.xlane.xlu1 %567  ;;  %v571_v43 = vpop.xlane.xlu0 %570 }
 0x1f2   : > { %2878 = vrsqrt.f32 %v622_v40  ;;  %v608_v44 = vmul.f32 0.00390625, %v568_v13  ;;  %v609_v53 = vmul.f32 0.00390625, %v571_v43  ;;  %v3840_v40 = vrot.slane %v427_v16, %v3824_v28 }
 0x1f3   : > { %2880 = vrsqrt.f32 %v623_v41 }
 0x1f4   : > { %v624_v29 = vadd.f32 1e-05, %v608_v44  ;;  %v625_v15 = vadd.f32 1e-05, %v609_v53 }
 0x1f5   : > { %v574_v56 = vpop.xlane.xlu1 %573  ;;  %v577_v32 = vpop.xlane.xlu0 %576 }
 0x1f6   : > { %2882 = vrsqrt.f32 %v624_v29  ;;  %v610_v63 = vmul.f32 0.00390625, %v574_v56  ;;  %v611_v10 = vmul.f32 0.00390625, %v577_v32 }
 0x1f7   : > { %2884 = vrsqrt.f32 %v625_v15 }
 0x1f8   : > { %v2877_v19 = vpop.eup %2876  ;;  %v626_v21 = vadd.f32 1e-05, %v610_v63  ;;  %v627_v37 = vadd.f32 1e-05, %v611_v10 }
 0x1f9   : > { %v580_v33 = vpop.xlane.xlu1 %579  ;;  %v654_v35 = vmul.f32 %v2877_v19, %v3662_v59  ;;  %v653_v36 = vmul.f32 %v2877_v19, %v3659_v58  ;;  %v583_v38 = vpop.xlane.xlu0 %582 }
 0x1fa   : > { %2886 = vrsqrt.f32 %v626_v21  ;;  %v612_v39 = vmul.f32 0.00390625, %v580_v33  ;;  %v613_v43 = vmul.f32 0.00390625, %v583_v38 }
 0x1fb   : > { %v697_v5 = vmul.f32 %v3827_v18, %v654_v35  ;;  %v696_v42 = vmul.f32 %v3830_v34, %v653_v36  ;;  %v2828_v36 = vld [vmem:[#allocation8 + $0x10] ss:$24 sps:$4 sm:$0xff]  }
 0x1fc   : > { %v2879_v25 = vpop.eup %2878  ;;  %v628_v26 = vadd.f32 1e-05, %v612_v39  ;;  %v629_v33 = vadd.f32 1e-05, %v613_v43 }
 0x1fd   : > { %v2881_v41 = vpop.eup %2880  ;;  %v586_v59 = vpop.xlane.xlu1 %585  ;;  %v656_v58 = vmul.f32 %v2879_v25, %v3682_v4  ;;  %v655_v13 = vmul.f32 %v2879_v25, %v3679_v11  ;;  %v740_v15 = vadd.f32 %v3836_v22, %v697_v5  ;;  %v739_v63 = vadd.f32 %v3840_v40, %v696_v42 }
 0x1fe   : > { %2888 = vrsqrt.f32 %v628_v26  ;;  %v614_v44 = vmul.f32 0.00390625, %v586_v59  ;;  %v658_v53 = vmul.f32 %v2881_v41, %v3668_v61  ;;  %v657_v11 = vmul.f32 %v2881_v41, %v3665_v60  ;;  %v589_v60 = vpop.xlane.xlu0 %588  ;;  %v2833_v26 = vld [vmem:[#allocation8 + $0x44] ss:$24 sps:$4 sm:$0xff]  }
 0x1ff   : > { %2890 = vrsqrt.f32 %v627_v37  ;;  %v699_v29 = vmul.f32 %v3827_v18, %v656_v58  ;;  %v698_v31 = vmul.f32 %v3830_v34, %v655_v13  ;;  %v615_v13 = vmul.f32 0.00390625, %v589_v60 }
 0x200   : > { %v2883_v56 = vpop.eup %2882  ;;  %v630_v32 = vadd.f32 1e-05, %v614_v44  ;;  %v701_v4 = vmul.f32 %v3827_v18, %v658_v53  ;;  %v2831_v44 = vld [vmem:[#allocation8 + $0x40] ss:$24 sps:$4 sm:$0xff]  }
 0x201   : > { %v742_v10 = vadd.f32 %v3836_v22, %v699_v29  ;;  %v741_v19 = vadd.f32 %v3840_v40, %v698_v31  ;;  %v660_v61 = vmul.f32 %v2883_v56, %v3688_v24  ;;  %v659_v21 = vmul.f32 %v2883_v56, %v3685_v17  ;;  %v2885_v16 = vpop.eup %2884  ;;  %v592_v35 = vpop.xlane.xlu1 %591 }
 0x202   : > { %2892 = vrsqrt.f32 %v630_v32  ;;  %v744_v25 = vadd.f32 %v3836_v22, %v701_v4  ;;  %v700_v24 = vmul.f32 %v3830_v34, %v657_v11  ;;  %v616_v42 = vmul.f32 0.00390625, %v592_v35  ;;  %v595_v4 = vpop.xlane.xlu0 %594 }
 0x203   : > { %v3855_v39 = vpack.c.bf16 %v742_v10, %v740_v15  ;;  %v3857_v37 = vpack.c.bf16 %v741_v19, %v739_v63  ;;  %v703_v38 = vmul.f32 %v3827_v18, %v660_v61  ;;  %v702_v17 = vmul.f32 %v3830_v34, %v659_v21  ;;  %v2836_v15 = vld [vmem:[#allocation8 + $0x74] ss:$24 sps:$4 sm:$0xff]   ;;  %v2834_v21 = vld [vmem:[#allocation8 + $0x70] ss:$24 sps:$4 sm:$0xff]  }
 0x204   : > { %v2887_v5 = vpop.eup %2886  ;;  %v662_v59 = vmul.f32 %v2885_v16, %v3702_v45  ;;  %2894 = vrsqrt.f32 %v629_v33  ;;  %v632_v56 = vadd.f32 1e-05, %v616_v42  ;;  %v743_v32 = vadd.f32 %v3840_v40, %v700_v24  ;;  %v2837_v24 = vld [vmem:[#allocation8 + $0xa0] ss:$24 sps:$4 sm:$0xff]  }
 0x205   : > { %1427 = vmatprep.mubr.bf16.mxu0 %v3855_v39  ;;  %1540 = vmatprep.mubr.bf16.mxu1 %v3855_v39  ;;  %v746_v41 = vadd.f32 %v3836_v22, %v703_v38  ;;  %v664_v58 = vmul.f32 %v2887_v5, %v3708_v48  ;;  %v745_v53 = vadd.f32 %v3840_v40, %v702_v17  ;;  %v598_v11 = vpop.xlane.xlu1 %597  ;;  %v631_v61 = vadd.f32 1e-05, %v615_v13  ;;  %v2842_v17 = vld [vmem:[#allocation8 + $0xd4] ss:$24 sps:$4 sm:$0xff]  }
 0x206   : > { %1428 = vmatmul.mubr.bf16.vlgmr.msra.gmra.mrb[0].mxu0 %v3857_v37  ;;  %1541 = vmatmul.mubr.bf16.vlgmr.msra.gmra.mrb[0].mxu1 %v3857_v37  ;;  %v705_v45 = vmul.f32 %v3827_v18, %v662_v59  ;;  %v663_v63 = vmul.f32 %v2887_v5, %v3705_v47  ;;  %v661_v19 = vmul.f32 %v2885_v16, %v3699_v9  ;;  %2896 = vrsqrt.f32 %v632_v56  ;;  %v2839_v9 = vld [vmem:[#allocation8 + $0xa4] ss:$24 sps:$4 sm:$0xff]   ;;  %v2840_v56 = vld [vmem:[#allocation8 + $0xd0] ss:$24 sps:$4 sm:$0xff]  }
 0x207   : > { %1622 = vmatpush1.bf16.msra.mxu0 %v2828_v36  ;;  %2581 = vmatpush1.bf16.msra.mxu1 %v2828_v36  ;;  %v3870_v43 = vpack.c.bf16 %v746_v41, %v744_v25  ;;  %v707_v48 = vmul.f32 %v3827_v18, %v664_v58  ;;  %v3881_v33 = vpack.c.bf16 %v745_v53, %v743_v32  ;;  %v617_v5 = vmul.f32 0.00390625, %v595_v4 }
 0x208   : > { %v2889_v29 = vpop.eup %2888  ;;  %1623 = vmatprep.subr.bf16.mxu0 %v2833_v26  ;;  %2566 = vmatprep.subr.bf16.mxu1 %v2833_v26  ;;  %v748_v36 = vadd.f32 %v3836_v22, %v705_v45  ;;  %v706_v47 = vmul.f32 %v3830_v34, %v663_v63  ;;  %v618_v60 = vmul.f32 0.00390625, %v598_v11  ;;  %2898 = vrsqrt.f32 %v631_v61  ;;  %v601_v63 = vpop.xlane.xlu0 %600  ;;  %v2843_v61 = vld [vmem:[#allocation8 + $0x100] ss:$24 sps:$4 sm:$0xff]  }
 0x209   : > { %v2891_v31 = vpop.eup %2890  ;;  %1437 = vmatprep.mubr.bf16.mxu0 %v3870_v43  ;;  %1550 = vmatprep.mubr.bf16.mxu1 %v3870_v43  ;;  %v750_v10 = vadd.f32 %v3836_v22, %v707_v48  ;;  %v668_v35 = vmul.f32 %v2889_v29, %v3728_v62  ;;  %v704_v62 = vmul.f32 %v3830_v34, %v661_v19  ;;  %v633_v58 = vadd.f32 1e-05, %v617_v5 }
 0x20a   : > { %v666_v38 = vmul.f32 %v2891_v31, %v3722_v55  ;;  %v749_v42 = vadd.f32 %v3840_v40, %v706_v47  ;;  %v667_v59 = vmul.f32 %v2889_v29, %v3725_v57  ;;  %v634_v13 = vadd.f32 1e-05, %v618_v60 }
 0x20b   : > { %1624 = vmatpush1.bf16.msra.mxu0 %v2831_v44  ;;  %2582 = vmatpush1.bf16.msra.mxu1 %v2831_v44  ;;  %v3889_v25 = vpack.c.bf16 %v750_v10, %v748_v36  ;;  %v711_v26 = vmul.f32 %v3827_v18, %v668_v35  ;;  %v604_v44 = vpop.xlane.xlu1 %603  ;;  %v747_v53 = vadd.f32 %v3840_v40, %v704_v62  ;;  %v2845_v10 = vld [vmem:[#allocation8 + $0x104] ss:$24 sps:$4 sm:$0xff]   ;;  %v619_v19 = vmul.f32 0.00390625, %v601_v63  ;;  %v2848_v35 = vld [vmem:[#allocation8 + $0x134] ss:$24 sps:$4 sm:$0xff]  }
 0x20c   : > { %1625 = vmatprep.subr.bf16.mxu0 %v2836_v15  ;;  %2567 = vmatprep.subr.bf16.mxu1 %v2836_v15  ;;  %v2893_v16 = vpop.eup %2892  ;;  %v709_v41 = vmul.f32 %v3827_v18, %v666_v38  ;;  %v665_v45 = vmul.f32 %v2891_v31, %v3719_v54  ;;  %v710_v4 = vmul.f32 %v3830_v34, %v667_v59  ;;  %2900 = vrsqrt.f32 %v634_v13  ;;  %v2851_v59 = vld [vmem:[#allocation8 + $0x164] ss:$24 sps:$4 sm:$0xff]   ;;  %v2849_v13 = vld [vmem:[#allocation8 + $0x160] ss:$24 sps:$4 sm:$0xff]  }
 0x20d   : > { %v754_v15 = vadd.f32 %v3836_v22, %v711_v26  ;;  %v672_v48 = vmul.f32 %v2893_v16, %v3748_v30  ;;  %v3903_v57 = vpack.c.bf16 %v749_v42, %v747_v53  ;;  %v620_v11 = vmul.f32 0.00390625, %v604_v44 }
 0x20e   : > { %1438 = vmatmul.mubr.bf16.gmra.mrb[4].mxu0 %v3881_v33  ;;  %1551 = vmatmul.mubr.bf16.gmra.mrb[4].mxu1 %v3881_v33  ;;  %v2895_v55 = vpop.eup %2894  ;;  %v752_v29 = vadd.f32 %v3836_v22, %v709_v41  ;;  %2902 = vrsqrt.f32 %v633_v58  ;;  %v753_v36 = vadd.f32 %v3840_v40, %v710_v4  ;;  %v671_v47 = vmul.f32 %v2893_v16, %v3745_v27 }
 0x20f   : > { %1626 = vmatpush1.bf16.msra.mxu0 %v2834_v21  ;;  %2583 = vmatpush1.bf16.msra.mxu1 %v2834_v21  ;;  %v670_v32 = vmul.f32 %v2895_v55, %v3742_v2  ;;  %v708_v2 = vmul.f32 %v3830_v34, %v665_v45  ;;  %v715_v30 = vmul.f32 %v3827_v18, %v672_v48  ;;  %v636_v5 = vadd.f32 1e-05, %v620_v11 }
 0x210   : > { %1447 = vmatprep.mubr.bf16.mxu0 %v3889_v25  ;;  %1560 = vmatprep.mubr.bf16.mxu1 %v3889_v25  ;;  %v3909_v54 = vpack.c.bf16 %v754_v15, %v752_v29  ;;  %v2897_v31 = vpop.eup %2896  ;;  %v669_v62 = vmul.f32 %v2895_v55, %v3739_v1  ;;  %v714_v16 = vmul.f32 %v3830_v34, %v671_v47  ;;  %v2852_v29 = vld [vmem:[#allocation8 + $0x190] ss:$24 sps:$4 sm:$0xff]  }
 0x211   : > { %1627 = vmatprep.subr.bf16.mxu0 %v2839_v9  ;;  %2568 = vmatprep.subr.bf16.mxu1 %v2839_v9  ;;  %v713_v21 = vmul.f32 %v3827_v18, %v670_v32  ;;  %v751_v60 = vadd.f32 %v3840_v40, %v708_v2  ;;  %v758_v9 = vadd.f32 %v3836_v22, %v715_v30  ;;  %2904 = vrsqrt.f32 %v636_v5  ;;  %v2857_v2 = vld [vmem:[#allocation8 + $0x1c4] ss:$24 sps:$4 sm:$0xff]  }
 0x212   : > { %v2899_v38 = vpop.eup %2898  ;;  %v676_v26 = vmul.f32 %v2897_v31, %v3768_v52  ;;  %v712_v52 = vmul.f32 %v3830_v34, %v669_v62  ;;  %v757_v53 = vadd.f32 %v3840_v40, %v714_v16  ;;  %v675_v45 = vmul.f32 %v2897_v31, %v3765_v51  ;;  %v2855_v31 = vld [vmem:[#allocation8 + $0x1c0] ss:$24 sps:$4 sm:$0xff]  }
 0x213   : > { %1628 = vmatpush1.bf16.msra.mxu0 %v2837_v24  ;;  %2584 = vmatpush1.bf16.msra.mxu1 %v2837_v24  ;;  %v635_v24 = vadd.f32 1e-05, %v619_v19  ;;  %v756_v42 = vadd.f32 %v3836_v22, %v713_v21  ;;  %v3923_v27 = vpack.c.bf16 %v753_v36, %v751_v60  ;;  %v674_v41 = vmul.f32 %v2899_v38, %v3762_v49  ;;  %v2854_v49 = vld [vmem:[#allocation8 + $0x194] ss:$24 sps:$4 sm:$0xff]   ;;  %v2861_v16 = vld [vmem:[#allocation8 + $0x220] ss:$24 sps:$4 sm:$0xff]  }
 0x214   : > { %1629 = vmatprep.subr.bf16.mxu0 %v2842_v17  ;;  %2569 = vmatprep.subr.bf16.mxu1 %v2842_v17  ;;  %v2846_v17 = vld [vmem:[#allocation8 + $0x130] ss:$24 sps:$4 sm:$0xff]   ;;  %v719_v55 = vmul.f32 %v3827_v18, %v676_v26  ;;  %v755_v48 = vadd.f32 %v3840_v40, %v712_v52  ;;  %v673_v32 = vmul.f32 %v2899_v38, %v3759_v46 }
 0x215   : > { %v3929_v1 = vpack.c.bf16 %v758_v9, %v756_v42  ;;  %2906 = vrsqrt.f32 %v635_v24  ;;  %v717_v15 = vmul.f32 %v3827_v18, %v674_v41  ;;  %v2858_v9 = vld [vmem:[#allocation8 + $0x1f0] ss:$24 sps:$4 sm:$0xff]   ;;  %v2866_v41 = vld [vmem:[#allocation8 + $0x254] ss:$24 sps:$4 sm:$0xff]  }
 0x216   : > { %1448 = vmatmul.mubr.bf16.gmra.mrb[8].mxu0 %v3903_v57  ;;  %1561 = vmatmul.mubr.bf16.gmra.mrb[8].mxu1 %v3903_v57  ;;  %v2901_v58 = vpop.eup %2900  ;;  %v3943_v11 = vpack.c.bf16 %v757_v53, %v755_v48  ;;  %v2867_v48 = vld [vmem:[#allocation8 + $0x280] ss:$24 sps:$4 sm:$0xff]  }
 0x217   : > { %1630 = vmatpush1.bf16.msra.mxu0 %v2840_v56  ;;  %2585 = vmatpush1.bf16.msra.mxu1 %v2840_v56  ;;  %v762_v56 = vadd.f32 %v3836_v22, %v719_v55  ;;  %v680_v63 = vmul.f32 %v2901_v58, %v3788_v20  ;;  %v760_v51 = vadd.f32 %v3836_v22, %v717_v15  ;;  %v2869_v15 = vld [vmem:[#allocation8 + $0x284] ss:$24 sps:$4 sm:$0xff]  }
 0x218   : > { %1457 = vmatprep.mubr.bf16.mxu0 %v3909_v54  ;;  %1570 = vmatprep.mubr.bf16.mxu1 %v3909_v54  ;;  %v2903_v44 = vpop.eup %2902  ;;  %v716_v20 = vmul.f32 %v3830_v34, %v673_v32  ;;  %v2870_v32 = vld [vmem:[#allocation8 + $0x2b0] ss:$24 sps:$4 sm:$0xff]  }
 0x219   : > { %1631 = vmatprep.subr.bf16.mxu0 %v2845_v10  ;;  %2570 = vmatprep.subr.bf16.mxu1 %v2845_v10  ;;  %v678_v4 = vmul.f32 %v2903_v44, %v3782_v7  ;;  %v718_v10 = vmul.f32 %v3830_v34, %v675_v45  ;;  %v3949_v46 = vpack.c.bf16 %v762_v56, %v760_v51 }
 0x21a   : > { %v723_v30 = vmul.f32 %v3827_v18, %v680_v63  ;;  %v759_v47 = vadd.f32 %v3840_v40, %v716_v20  ;;  %v677_v5 = vmul.f32 %v2903_v44, %v3779_v3  ;;  %v2864_v44 = vld [vmem:[#allocation8 + $0x250] ss:$24 sps:$4 sm:$0xff]  }
 0x21b   : > { %1632 = vmatpush1.bf16.msra.mxu0 %v2843_v61  ;;  %2586 = vmatpush1.bf16.msra.mxu1 %v2843_v61  ;;  %v2905_v7 = vpop.eup %2904  ;;  %v721_v19 = vmul.f32 %v3827_v18, %v678_v4  ;;  %v2860_v61 = vld [vmem:[#allocation8 + $0x1f4] ss:$24 sps:$4 sm:$0xff]   ;;  %v761_v21 = vadd.f32 %v3840_v40, %v718_v10 }
 0x21c   : > { %1633 = vmatprep.subr.bf16.mxu0 %v2848_v35  ;;  %2571 = vmatprep.subr.bf16.mxu1 %v2848_v35  ;;  %v679_v35 = vmul.f32 %v2901_v58, %v3785_v0  ;;  %v766_v38 = vadd.f32 %v3836_v22, %v723_v30  ;;  %v684_v60 = vmul.f32 %v2905_v7, %v3808_v50 }
 0x21d   : > { %v764_v62 = vadd.f32 %v3836_v22, %v721_v19  ;;  %v3963_v26 = vpack.c.bf16 %v761_v21, %v759_v47  ;;  %v720_v50 = vmul.f32 %v3830_v34, %v677_v5  ;;  %v683_v52 = vmul.f32 %v2905_v7, %v3805_v8 }
 0x21e   : > { %1458 = vmatmul.mubr.bf16.gmra.mrb[12].mxu0 %v3923_v27  ;;  %1571 = vmatmul.mubr.bf16.gmra.mrb[12].mxu1 %v3923_v27  ;;  %v722_v0 = vmul.f32 %v3830_v34, %v679_v35  ;;  %v727_v42 = vmul.f32 %v3827_v18, %v684_v60 }
 0x21f   : > { %1634 = vmatpush1.bf16.msra.mxu0 %v2846_v17  ;;  %2587 = vmatpush1.bf16.msra.mxu1 %v2846_v17  ;;  %v2907_v36 = vpop.eup %2906  ;;  %v2863_v17 = vld [vmem:[#allocation8 + $0x224] ss:$24 sps:$4 sm:$0xff]   ;;  %v3969_v3 = vpack.c.bf16 %v766_v38, %v764_v62  ;;  %v763_v55 = vadd.f32 %v3840_v40, %v720_v50 }
 0x220   : > { %1467 = vmatprep.mubr.bf16.mxu0 %v3929_v1  ;;  %1580 = vmatprep.mubr.bf16.mxu1 %v3929_v1  ;;  %v682_v24 = vmul.f32 %v2907_v36, %v3802_v6  ;;  %v765_v6 = vadd.f32 %v3840_v40, %v722_v0  ;;  %v770_v58 = vadd.f32 %v3836_v22, %v727_v42 }
 0x221   : > { %1635 = vmatprep.subr.bf16.mxu0 %v2851_v59  ;;  %2572 = vmatprep.subr.bf16.mxu1 %v2851_v59 }
 0x222   : > { %v725_v59 = vmul.f32 %v3827_v18, %v682_v24  ;;  %v726_v18 = vmul.f32 %v3830_v34, %v683_v52 }
 0x223   : > { %1636 = vmatpush1.bf16.msra.mxu0 %v2849_v13  ;;  %2588 = vmatpush1.bf16.msra.mxu1 %v2849_v13  ;;  %v681_v13 = vmul.f32 %v2907_v36, %v3799_v23  ;;  %v2872_v23 = vld [vmem:[#allocation8 + $0x2b4] ss:$24 sps:$4 sm:$0xff]  }
 0x224   : > { %1637 = vmatprep.subr.bf16.mxu0 %v2854_v49  ;;  %2573 = vmatprep.subr.bf16.mxu1 %v2854_v49  ;;  %v783_v49 = vpack.c.bf16 %v765_v6, %v763_v55  ;;  %v768_v53 = vadd.f32 %v3836_v22, %v725_v59  ;;  %v769_v56 = vadd.f32 %v3840_v40, %v726_v18 }
 0x225   : > { %v724_v45 = vmul.f32 %v3830_v34, %v681_v13  ;;  %v2873_v34 = vld [vmem:[#allocation8 + $0x2e0] ss:$24 sps:$4 sm:$0xff]  }
 0x226   : > { %1468 = vmatmul.mubr.bf16.gmra.mrb[16].mxu0 %v3943_v11  ;;  %1581 = vmatmul.mubr.bf16.gmra.mrb[16].mxu1 %v3943_v11  ;;  %v786_v8 = vpack.c.bf16 %v770_v58, %v768_v53 }
 0x227   : > { %1638 = vmatpush1.bf16.msra.mxu0 %v2852_v29  ;;  %2589 = vmatpush1.bf16.msra.mxu1 %v2852_v29  ;;  %v767_v22 = vadd.f32 %v3840_v40, %v724_v45  ;;  %v2875_v29 = vld [vmem:[#allocation8 + $0x2e4] ss:$24 sps:$4 sm:$0xff]   ;;  %v895_v40 = vsub.s32 2, %v3818_v12 }
 0x228   : > { %1477 = vmatprep.mubr.bf16.mxu0 %v3949_v46  ;;  %1590 = vmatprep.mubr.bf16.mxu1 %v3949_v46 }
 0x229   : > { %1639 = vmatprep.subr.bf16.mxu0 %v2857_v2  ;;  %2574 = vmatprep.subr.bf16.mxu1 %v2857_v2  ;;  %v785_v63 = vpack.c.bf16 %v769_v56, %v767_v22 }
 0x22b   : > { %1640 = vmatpush1.bf16.msra.mxu0 %v2855_v31  ;;  %2590 = vmatpush1.bf16.msra.mxu1 %v2855_v31 }
 0x22c   : > { %1641 = vmatprep.subr.bf16.mxu0 %v2860_v61  ;;  %2575 = vmatprep.subr.bf16.mxu1 %v2860_v61 }
 0x22e   : > { %1478 = vmatmul.mubr.bf16.gmra.mrb[20].mxu0 %v3963_v26  ;;  %1591 = vmatmul.mubr.bf16.gmra.mrb[20].mxu1 %v3963_v26 }
 0x22f   : > { %1642 = vmatpush1.bf16.msra.mxu0 %v2858_v9  ;;  %2591 = vmatpush1.bf16.msra.mxu1 %v2858_v9 }
 0x230   : > { %1487 = vmatprep.mubr.bf16.mxu0 %v3969_v3  ;;  %1600 = vmatprep.mubr.bf16.mxu1 %v3969_v3 }
 0x231   : > { %1643 = vmatprep.subr.bf16.mxu0 %v2863_v17  ;;  %2576 = vmatprep.subr.bf16.mxu1 %v2863_v17 }
 0x233   : > { %1644 = vmatpush1.bf16.msra.mxu0 %v2861_v16  ;;  %2592 = vmatpush1.bf16.msra.mxu1 %v2861_v16 }
 0x234   : > { %1645 = vmatprep.subr.bf16.mxu0 %v2866_v41  ;;  %2577 = vmatprep.subr.bf16.mxu1 %v2866_v41 }
 0x236   : > { %1488 = vmatmul.mubr.bf16.gmra.mrb[24].mxu0 %v783_v49  ;;  %1601 = vmatmul.mubr.bf16.gmra.mrb[24].mxu1 %v783_v49 }
 0x237   : > { %1646 = vmatpush1.bf16.msra.mxu0 %v2864_v44  ;;  %2593 = vmatpush1.bf16.msra.mxu1 %v2864_v44 }
 0x238   : > { %1497 = vmatprep.mubr.bf16.mxu0 %v786_v8  ;;  %1610 = vmatprep.mubr.bf16.mxu1 %v786_v8 }
 0x239   : > { %1647 = vmatprep.subr.bf16.mxu0 %v2869_v15  ;;  %2578 = vmatprep.subr.bf16.mxu1 %v2869_v15 }
 0x23b   : > { %1648 = vmatpush1.bf16.msra.mxu0 %v2867_v48  ;;  %2594 = vmatpush1.bf16.msra.mxu1 %v2867_v48 }
 0x23c   : > { %1649 = vmatprep.subr.bf16.mxu0 %v2872_v23  ;;  %2579 = vmatprep.subr.bf16.mxu1 %v2872_v23 }
 0x23e   : > { %1498 = vmatmul.mubr.bf16.gmra.mrb[28].mxu0 %v785_v63  ;;  %1611 = vmatmul.mubr.bf16.gmra.mrb[28].mxu1 %v785_v63 }
 0x23f   : > { %1650 = vmatpush1.bf16.msra.mxu0 %v2870_v32  ;;  %2595 = vmatpush1.bf16.msra.mxu1 %v2870_v32 }
 0x240   : > { %1653 = vmatprep.mubr.bf16.mxu0 %v3855_v39  ;;  %1693 = vmatprep.mubr.bf16.mxu1 %v3929_v1  ;;  %v4000_v39 = vld [vmem:[#allocation10] sm:$0x3f] }
 0x241   : > { %1651 = vmatprep.subr.bf16.mxu0 %v2875_v29  ;;  %2580 = vmatprep.subr.bf16.mxu1 %v2875_v29 }
 0x243   : > { %1652 = vmatpush1.bf16.msra.mxu0 %v2873_v34  ;;  %2596 = vmatpush1.bf16.msra.mxu1 %v2873_v34 }
 0x246   : > { %1654 = vmatmul.mubr.bf16.vlgmr.msra.gmra.mrb[32].mxu0 %v3857_v37  ;;  %1694 = vmatmul.mubr.bf16.vlgmr.msra.gmra.mrb[32].mxu1 %v3943_v11  ;;  %v899_v37 = vsub.s32 3, %v3818_v12 }
 0x247   : > { %1663 = vmatprep.mubr.bf16.mxu0 %v3870_v43  ;;  %1703 = vmatprep.mubr.bf16.mxu1 %v3949_v46  ;;  %v4005_v43 = vrot.slane %v4000_v39, %v3824_v28 }
 0x24e   : > { %1664 = vmatmul.mubr.bf16.gmra.mrb[36].mxu0 %v3881_v33  ;;  %1704 = vmatmul.mubr.bf16.gmra.mrb[36].mxu1 %v3963_v26  ;;  %v4008_v33 = vrot.slane %v4000_v39, %v895_v40 }
 0x24f   : > { %1673 = vmatprep.mubr.bf16.mxu0 %v3889_v25  ;;  %1713 = vmatprep.mubr.bf16.mxu1 %v3969_v3  ;;  %v4012_v25 = vrot.slane %v4000_v39, %v3821_v14 }
 0x256   : > { %1674 = vmatmul.mubr.bf16.gmra.mrb[40].mxu0 %v3903_v57  ;;  %1714 = vmatmul.mubr.bf16.gmra.mrb[40].mxu1 %v783_v49  ;;  %v4015_v57 = vrot.slane %v4000_v39, %v899_v37 }
 0x257   : > { %1683 = vmatprep.mubr.bf16.mxu0 %v3909_v54  ;;  %1723 = vmatprep.mubr.bf16.mxu1 %v786_v8 }
 0x25e   : > { %1684 = vmatmul.mubr.bf16.gmra.mrb[44].mxu0 %v3923_v27  ;;  %1724 = vmatmul.mubr.bf16.gmra.mrb[44].mxu1 %v785_v63 }
 0x2d9   : > { %v1429_v54 = vpop.f32.mrb[0].mxu0  ;;  %v1542_v27 = vpop.f32.mrb[0].mxu1 }
 0x2da   : > { %v1430_v1 = vadd.f32 %v1429_v54, %v4005_v43  ;;  %v1543_v28 = vadd.f32 %v1542_v27, %v4008_v33  ;;  %v1431_v4 = vpop.f32.mrb[1].mxu0  ;;  %v1544_v11 = vpop.f32.mrb[1].mxu1 }
 0x2db   : > { %v1432_v51 = vadd.f32 %v1431_v4, %v4012_v25  ;;  %v1545_v14 = vadd.f32 %v1544_v11, %v4015_v57  ;;  %v1433_v10 = vpop.f32.mrb[2].mxu0  ;;  %v1546_v2 = vpop.f32.mrb[2].mxu1 }
 0x2dc   : > { %v1434_v46 = vadd.f32 %v1433_v10, %v4005_v43  ;;  %v1547_v20 = vadd.f32 %v1546_v2, %v4008_v33  ;;  %v1435_v30 = vpop.f32.mrb[3].mxu0  ;;  %v1548_v7 = vpop.f32.mrb[3].mxu1 }
 0x2dd   : > { %v2514_v31 = vpack.c.bf16 %v1432_v51, %v1430_v1  ;;  %v2530_v19 = vpack.c.bf16 %v1545_v14, %v1543_v28  ;;  %v1436_v61 = vadd.f32 %v1435_v30, %v4012_v25  ;;  %v1549_v21 = vadd.f32 %v1548_v7, %v4015_v57 }
 0x2df   : > { %1830 = vst [vmem:[%s4029_s11] sm:$0xff] %v2514_v31  ;;  %1942 = vst [vmem:[%s4033_s13] sm:$0xff] %v2530_v19  ;;  %v2515_v35 = vpack.c.bf16 %v1436_v61, %v1434_v46  ;;  %v2531_v36 = vpack.c.bf16 %v1549_v21, %v1547_v20 }
 0x2e1   : > { %1831 = vst [vmem:[%s4029_s11 + $0x8] sm:$0xff] %v2515_v35  ;;  %1943 = vst [vmem:[%s4033_s13 + $0x8] sm:$0xff] %v2531_v36  ;;  %v1439_v47 = vpop.f32.mrb[4].mxu0  ;;  %v1552_v38 = vpop.f32.mrb[4].mxu1 }
 0x2e2   : > { %v1440_v5 = vadd.f32 %v1439_v47, %v4005_v43  ;;  %v1553_v60 = vadd.f32 %v1552_v38, %v4008_v33  ;;  %v1441_v9 = vpop.f32.mrb[5].mxu0  ;;  %v1554_v62 = vpop.f32.mrb[5].mxu1 }
 0x2e3   : > { %v1442_v26 = vadd.f32 %v1441_v9, %v4012_v25  ;;  %v1555_v0 = vadd.f32 %v1554_v62, %v4015_v57  ;;  %v1443_v24 = vpop.f32.mrb[6].mxu0  ;;  %v1556_v17 = vpop.f32.mrb[6].mxu1 }
 0x2e4   : > { %v1444_v3 = vadd.f32 %v1443_v24, %v4005_v43  ;;  %v1557_v50 = vadd.f32 %v1556_v17, %v4008_v33  ;;  %v1445_v42 = vpop.f32.mrb[7].mxu0  ;;  %v1558_v16 = vpop.f32.mrb[7].mxu1 }
 0x2e5   : > { %v2516_v41 = vpack.c.bf16 %v1442_v26, %v1440_v5  ;;  %v2532_v6 = vpack.c.bf16 %v1555_v0, %v1553_v60  ;;  %v1446_v59 = vadd.f32 %v1445_v42, %v4012_v25  ;;  %v1559_v52 = vadd.f32 %v1558_v16, %v4015_v57 }
 0x2e7   : > { %1832 = vst [vmem:[%s4029_s11 + $0x10] sm:$0xff] %v2516_v41  ;;  %1944 = vst [vmem:[%s4033_s13 + $0x10] sm:$0xff] %v2532_v6  ;;  %v2517_v55 = vpack.c.bf16 %v1446_v59, %v1444_v3  ;;  %v2533_v58 = vpack.c.bf16 %v1559_v52, %v1557_v50 }
 0x2e9   : > { %1833 = vst [vmem:[%s4029_s11 + $0x18] sm:$0xff] %v2517_v55  ;;  %1945 = vst [vmem:[%s4033_s13 + $0x18] sm:$0xff] %v2533_v58  ;;  %v1449_v13 = vpop.f32.mrb[8].mxu0  ;;  %v1562_v44 = vpop.f32.mrb[8].mxu1 }
 0x2ea   : > { %v1450_v49 = vadd.f32 %v1449_v13, %v4005_v43  ;;  %v1563_v53 = vadd.f32 %v1562_v44, %v4008_v33  ;;  %v1451_v18 = vpop.f32.mrb[9].mxu0  ;;  %v1564_v15 = vpop.f32.mrb[9].mxu1 }
 0x2eb   : > { %v1452_v8 = vadd.f32 %v1451_v18, %v4012_v25  ;;  %v1565_v45 = vadd.f32 %v1564_v15, %v4015_v57  ;;  %v1453_v48 = vpop.f32.mrb[10].mxu0  ;;  %v1566_v23 = vpop.f32.mrb[10].mxu1 }
 0x2ec   : > { %v1454_v56 = vadd.f32 %v1453_v48, %v4005_v43  ;;  %v1567_v22 = vadd.f32 %v1566_v23, %v4008_v33  ;;  %v1455_v32 = vpop.f32.mrb[11].mxu0  ;;  %v1568_v63 = vpop.f32.mrb[11].mxu1 }
 0x2ed   : > { %v2518_v29 = vpack.c.bf16 %v1452_v8, %v1450_v49  ;;  %v2534_v34 = vpack.c.bf16 %v1565_v45, %v1563_v53  ;;  %v1456_v40 = vadd.f32 %v1455_v32, %v4012_v25  ;;  %v1569_v37 = vadd.f32 %v1568_v63, %v4015_v57 }
 0x2ef   : > { %1834 = vst [vmem:[%s4029_s11 + $0x20] sm:$0xff] %v2518_v29  ;;  %1946 = vst [vmem:[%s4033_s13 + $0x20] sm:$0xff] %v2534_v34  ;;  %v2519_v54 = vpack.c.bf16 %v1456_v40, %v1454_v56  ;;  %v2535_v27 = vpack.c.bf16 %v1569_v37, %v1567_v22 }
 0x2f1   : > { %1835 = vst [vmem:[%s4029_s11 + $0x28] sm:$0xff] %v2519_v54  ;;  %1947 = vst [vmem:[%s4033_s13 + $0x28] sm:$0xff] %v2535_v27  ;;  %v1459_v1 = vpop.f32.mrb[12].mxu0  ;;  %v1572_v28 = vpop.f32.mrb[12].mxu1 }
 0x2f2   : > { %v1460_v4 = vadd.f32 %v1459_v1, %v4005_v43  ;;  %v1573_v11 = vadd.f32 %v1572_v28, %v4008_v33  ;;  %v1461_v51 = vpop.f32.mrb[13].mxu0  ;;  %v1574_v14 = vpop.f32.mrb[13].mxu1 }
 0x2f3   : > { %v1462_v10 = vadd.f32 %v1461_v51, %v4012_v25  ;;  %v1575_v2 = vadd.f32 %v1574_v14, %v4015_v57  ;;  %v1463_v46 = vpop.f32.mrb[14].mxu0  ;;  %v1576_v20 = vpop.f32.mrb[14].mxu1 }
 0x2f4   : > { %v1464_v30 = vadd.f32 %v1463_v46, %v4005_v43  ;;  %v1577_v7 = vadd.f32 %v1576_v20, %v4008_v33  ;;  %v1465_v31 = vpop.f32.mrb[15].mxu0  ;;  %v1578_v19 = vpop.f32.mrb[15].mxu1 }
 0x2f5   : > { %v2520_v61 = vpack.c.bf16 %v1462_v10, %v1460_v4  ;;  %v2536_v21 = vpack.c.bf16 %v1575_v2, %v1573_v11  ;;  %v1466_v35 = vadd.f32 %v1465_v31, %v4012_v25  ;;  %v1579_v36 = vadd.f32 %v1578_v19, %v4015_v57 }
 0x2f7   : > { %1836 = vst [vmem:[%s4029_s11 + $0x30] sm:$0xff] %v2520_v61  ;;  %1948 = vst [vmem:[%s4033_s13 + $0x30] sm:$0xff] %v2536_v21  ;;  %v2521_v47 = vpack.c.bf16 %v1466_v35, %v1464_v30  ;;  %v2537_v38 = vpack.c.bf16 %v1579_v36, %v1577_v7 }
 0x2f9   : > { %1837 = vst [vmem:[%s4029_s11 + $0x38] sm:$0xff] %v2521_v47  ;;  %1949 = vst [vmem:[%s4033_s13 + $0x38] sm:$0xff] %v2537_v38  ;;  %v1469_v5 = vpop.f32.mrb[16].mxu0  ;;  %v1582_v60 = vpop.f32.mrb[16].mxu1 }
 0x2fa   : > { %v1470_v9 = vadd.f32 %v1469_v5, %v4005_v43  ;;  %v1583_v62 = vadd.f32 %v1582_v60, %v4008_v33  ;;  %v1471_v26 = vpop.f32.mrb[17].mxu0  ;;  %v1584_v0 = vpop.f32.mrb[17].mxu1 }
 0x2fb   : > { %v1472_v24 = vadd.f32 %v1471_v26, %v4012_v25  ;;  %v1585_v17 = vadd.f32 %v1584_v0, %v4015_v57  ;;  %v1473_v3 = vpop.f32.mrb[18].mxu0  ;;  %v1586_v50 = vpop.f32.mrb[18].mxu1 }
 0x2fc   : > { %v1474_v42 = vadd.f32 %v1473_v3, %v4005_v43  ;;  %v1587_v16 = vadd.f32 %v1586_v50, %v4008_v33  ;;  %v1475_v41 = vpop.f32.mrb[19].mxu0  ;;  %v1588_v6 = vpop.f32.mrb[19].mxu1  ;;  %v903_v3 = vsub.s32 4, %v3818_v12 }
 0x2fd   : > { %v2522_v59 = vpack.c.bf16 %v1472_v24, %v1470_v9  ;;  %v2538_v52 = vpack.c.bf16 %v1585_v17, %v1583_v62  ;;  %v1476_v55 = vadd.f32 %v1475_v41, %v4012_v25  ;;  %v1589_v58 = vadd.f32 %v1588_v6, %v4015_v57 }
 0x2fe   : > { %v907_v6 = vsub.s32 5, %v3818_v12  ;;  %v4128_v12 = vrot.slane %v4000_v39, %v903_v3 }
 0x2ff   : > { %1838 = vst [vmem:[%s4029_s11 + $0x40] sm:$0xff] %v2522_v59  ;;  %1950 = vst [vmem:[%s4033_s13 + $0x40] sm:$0xff] %v2538_v52  ;;  %v2523_v13 = vpack.c.bf16 %v1476_v55, %v1474_v42  ;;  %v2539_v44 = vpack.c.bf16 %v1589_v58, %v1587_v16 }
 0x301   : > { %1839 = vst [vmem:[%s4029_s11 + $0x48] sm:$0xff] %v2523_v13  ;;  %1951 = vst [vmem:[%s4033_s13 + $0x48] sm:$0xff] %v2539_v44  ;;  %v1479_v49 = vpop.f32.mrb[20].mxu0  ;;  %v1592_v53 = vpop.f32.mrb[20].mxu1 }
 0x302   : > { %v1480_v18 = vadd.f32 %v1479_v49, %v4005_v43  ;;  %v1593_v15 = vadd.f32 %v1592_v53, %v4008_v33  ;;  %v1481_v8 = vpop.f32.mrb[21].mxu0  ;;  %v1594_v45 = vpop.f32.mrb[21].mxu1 }
 0x303   : > { %v1482_v48 = vadd.f32 %v1481_v8, %v4012_v25  ;;  %v1595_v23 = vadd.f32 %v1594_v45, %v4015_v57  ;;  %v1483_v56 = vpop.f32.mrb[22].mxu0  ;;  %v1596_v22 = vpop.f32.mrb[22].mxu1 }
 0x304   : > { %v1484_v32 = vadd.f32 %v1483_v56, %v4005_v43  ;;  %v1597_v63 = vadd.f32 %v1596_v22, %v4008_v33  ;;  %v1485_v29 = vpop.f32.mrb[23].mxu0  ;;  %v1598_v34 = vpop.f32.mrb[23].mxu1 }
 0x305   : > { %v2524_v40 = vpack.c.bf16 %v1482_v48, %v1480_v18  ;;  %v2540_v37 = vpack.c.bf16 %v1595_v23, %v1593_v15  ;;  %v1486_v54 = vadd.f32 %v1485_v29, %v4012_v25  ;;  %v1599_v27 = vadd.f32 %v1598_v34, %v4015_v57 }
 0x306   : > { %v4139_v18 = vrot.slane %v4000_v39, %v907_v6 }
 0x307   : > { %1840 = vst [vmem:[%s4029_s11 + $0x50] sm:$0xff] %v2524_v40  ;;  %1952 = vst [vmem:[%s4033_s13 + $0x50] sm:$0xff] %v2540_v37  ;;  %v2525_v1 = vpack.c.bf16 %v1486_v54, %v1484_v32  ;;  %v2541_v28 = vpack.c.bf16 %v1599_v27, %v1597_v63 }
 0x309   : > { %1841 = vst [vmem:[%s4029_s11 + $0x58] sm:$0xff] %v2525_v1  ;;  %1953 = vst [vmem:[%s4033_s13 + $0x58] sm:$0xff] %v2541_v28  ;;  %v1489_v4 = vpop.f32.mrb[24].mxu0  ;;  %v1602_v11 = vpop.f32.mrb[24].mxu1 }
 0x30a   : > { %v1490_v51 = vadd.f32 %v1489_v4, %v4005_v43  ;;  %v1603_v14 = vadd.f32 %v1602_v11, %v4008_v33  ;;  %v1491_v10 = vpop.f32.mrb[25].mxu0  ;;  %v1604_v2 = vpop.f32.mrb[25].mxu1 }
 0x30b   : > { %v1492_v46 = vadd.f32 %v1491_v10, %v4012_v25  ;;  %v1605_v20 = vadd.f32 %v1604_v2, %v4015_v57  ;;  %v1493_v30 = vpop.f32.mrb[26].mxu0  ;;  %v1606_v7 = vpop.f32.mrb[26].mxu1 }
 0x30c   : > { %v1494_v31 = vadd.f32 %v1493_v30, %v4005_v43  ;;  %v1607_v19 = vadd.f32 %v1606_v7, %v4008_v33  ;;  %v1495_v61 = vpop.f32.mrb[27].mxu0  ;;  %v1608_v21 = vpop.f32.mrb[27].mxu1 }
 0x30d   : > { %v2526_v35 = vpack.c.bf16 %v1492_v46, %v1490_v51  ;;  %v2542_v36 = vpack.c.bf16 %v1605_v20, %v1603_v14  ;;  %v1496_v47 = vadd.f32 %v1495_v61, %v4012_v25  ;;  %v1609_v38 = vadd.f32 %v1608_v21, %v4015_v57 }
 0x30f   : > { %1842 = vst [vmem:[%s4029_s11 + $0x60] sm:$0xff] %v2526_v35  ;;  %1954 = vst [vmem:[%s4033_s13 + $0x60] sm:$0xff] %v2542_v36  ;;  %v2527_v5 = vpack.c.bf16 %v1496_v47, %v1494_v31  ;;  %v2543_v60 = vpack.c.bf16 %v1609_v38, %v1607_v19 }
 0x311   : > { %1843 = vst [vmem:[%s4029_s11 + $0x68] sm:$0xff] %v2527_v5  ;;  %1955 = vst [vmem:[%s4033_s13 + $0x68] sm:$0xff] %v2543_v60  ;;  %v1499_v9 = vpop.f32.mrb[28].mxu0  ;;  %v1612_v62 = vpop.f32.mrb[28].mxu1 }
 0x312   : > { %v1500_v26 = vadd.f32 %v1499_v9, %v4005_v43  ;;  %v1613_v0 = vadd.f32 %v1612_v62, %v4008_v33  ;;  %v1501_v24 = vpop.f32.mrb[29].mxu0  ;;  %v1614_v17 = vpop.f32.mrb[29].mxu1 }
 0x313   : > { %v1502_v50 = vadd.f32 %v1501_v24, %v4012_v25  ;;  %v1615_v42 = vadd.f32 %v1614_v17, %v4015_v57  ;;  %v1503_v16 = vpop.f32.mrb[30].mxu0  ;;  %v1616_v41 = vpop.f32.mrb[30].mxu1 }
 0x314   : > { %v1504_v59 = vadd.f32 %v1503_v16, %v4005_v43  ;;  %v1617_v52 = vadd.f32 %v1616_v41, %v4008_v33  ;;  %v1505_v55 = vpop.f32.mrb[31].mxu0  ;;  %v1618_v58 = vpop.f32.mrb[31].mxu1 }
 0x315   : > { %v2528_v13 = vpack.c.bf16 %v1502_v50, %v1500_v26  ;;  %v2544_v44 = vpack.c.bf16 %v1615_v42, %v1613_v0  ;;  %v1506_v49 = vadd.f32 %v1505_v55, %v4012_v25  ;;  %v1619_v53 = vadd.f32 %v1618_v58, %v4015_v57 }
 0x317   : > { %1844 = vst [vmem:[%s4029_s11 + $0x70] sm:$0xff] %v2528_v13  ;;  %1956 = vst [vmem:[%s4033_s13 + $0x70] sm:$0xff] %v2544_v44  ;;  %v2529_v43 = vpack.c.bf16 %v1506_v49, %v1504_v59  ;;  %v2545_v33 = vpack.c.bf16 %v1619_v53, %v1617_v52 }
 0x319   : > { %1845 = vst [vmem:[%s4029_s11 + $0x78] sm:$0xff] %v2529_v43  ;;  %1957 = vst [vmem:[%s4033_s13 + $0x78] sm:$0xff] %v2545_v33  ;;  %v1655_v25 = vpop.f32.mrb[32].mxu0  ;;  %v1695_v57 = vpop.f32.mrb[32].mxu1  ;;  %s3227_s11 = smov [#allocation12]  }
 0x31a   : > { %v4154_v15 = vadd.f32 %v1655_v25, %v4128_v12  ;;  %v4157_v39 = vadd.f32 %v1695_v57, %v4128_v12  ;;  %v1657_v8 = vpop.f32.mrb[33].mxu0  ;;  %v1697_v45 = vpop.f32.mrb[33].mxu1  ;;  %s3054_s13 = sshll.u32 %s3227_s11, 4  ;;  %s3055_s13 = int_to_ptr.vmem [resolvable:$false] %s3054_s13 }
 0x31b   : > { %s3056_s17 = scalar_lea.vmem %s3055_s13, 4096  ;;  %p3057_p7 = scmp.lt.s32.totalorder %s4141_s28, %s3055_s13 }
 0x31c   : > { %p3058_p12 = scmp.lt.s32.totalorder %s3056_s17, %s3050_s16 }
 0x31e   : > { %p3059_p11 = por %p3058_p12, %p3057_p7 }
 0x320   : > { %p3060_p13 = pnand %p3059_p11, %p3053_p3 }
 0x322   : > { %3063 = shalt.err (!%p3060_p13)
}
 0x323   : > { %s3064_s9 = scalar_lea.hbm %s4134_s21, 2048  ;;  %s3068_s22 = scalar_lea.hbm %s4336_s6, 8192 }
 0x324   : > { %p3065_p5 = scmp.ne.s32.totalorder %s4134_s21, %s3064_s9  ;;  %p3069_p2 = scmp.lt.u32.totalorder %s4134_s21, %s4336_s6 }
 0x325   : > { %p3070_p10 = scmp.lt.u32.totalorder %s3068_s22, %s3064_s9  ;;  %p3072_p6 = scmp.lt.u32.totalorder %s3064_s9, %s4134_s21 }
 0x326   : > { %p3066_p9 = pnand %p3065_p5, %p3451_p4 }
 0x327   : > { %p3071_p1 = por %p3070_p10, %p3069_p2 }
 0x328   : > { %p3067_p0 = pneg %p3066_p9 }
 0x329   : > { %p3073_p8 = por %p3072_p6, %p3071_p1 }
 0x32b   : > { %p3074_p3 = pnand %p3073_p8, %p3067_p0 }
 0x32d   : > { %3077 = shalt.err (!%p3074_p3)
}
 0x32e   : > { %s3228_s15 = smov 128   ;;  %s3229_s20 = smov 8   ;;  %v1658_v48 = vadd.f32 %v1657_v8, %v4139_v18  ;;  %v1698_v23 = vadd.f32 %v1697_v45, %v4139_v18  ;;  %v1659_v56 = vpop.f32.mrb[34].mxu0  ;;  %v1699_v22 = vpop.f32.mrb[34].mxu1 }
 0x32f   : > { %2616 = dma.vmem_to_hbm [thread:$0]  (%p3451_p4), %s4141_s28, 2048, %s4134_s21, %s4161_s4, %s3228_s15, %s3228_s15, %s3229_s20  }
 0x330   : > { %s2071_s16 = scalar_lea.sflag [#allocation4], %s3512_s23  ;;  %s3078_s11 = scalar_lea.vmem %s4149_s14, 2048 }
 0x331   : > { %p3079_p7 = scmp.ne.s32.totalorder %s4149_s14, %s3078_s11  ;;  %s3230_s13 = smov [#allocation11]  }
 0x332   : > { %s3082_s17 = sshll.u32 %s3230_s13, 4  ;;  %s3083_s17 = int_to_ptr.vmem [resolvable:$false] %s3082_s17 }
 0x333   : > { %p3080_p12 = pnand %p3079_p7, %p3451_p4  ;;  %s3084_s9 = scalar_lea.vmem %s3083_s17, 4096 }
 0x334   : > { %p3085_p13 = scmp.lt.s32.totalorder %s4149_s14, %s3083_s17  ;;  %p3086_p5 = scmp.lt.s32.totalorder %s3084_s9, %s3078_s11 }
 0x335   : > { %p3081_p11 = pneg %p3080_p12 }
 0x336   : > { %p3087_p9 = por %p3086_p5, %p3085_p13 }
 0x338   : > { %p3088_p0 = pnand %p3087_p9, %p3081_p11 }
 0x33a   : > { %3091 = shalt.err (!%p3088_p0)
}
 0x33b   : > { %s3092_s28 = scalar_lea.hbm %s4147_s3, 2048  ;;  %s3096_s18 = scalar_lea.hbm %s4375_s10, 8192 }
 0x33c   : > { %p3093_p2 = scmp.ne.s32.totalorder %s4147_s3, %s3092_s28  ;;  %p3097_p6 = scmp.lt.u32.totalorder %s4147_s3, %s4375_s10 }
 0x33d   : > { %p3098_p8 = scmp.lt.u32.totalorder %s3096_s18, %s3092_s28  ;;  %p3100_p7 = scmp.lt.u32.totalorder %s3092_s28, %s4147_s3 }
 0x33e   : > { %p3094_p10 = pnand %p3093_p2, %p3451_p4 }
 0x33f   : > { %p3099_p3 = por %p3098_p8, %p3097_p6 }
 0x340   : > { %p3095_p1 = pneg %p3094_p10 }
 0x341   : > { %p3101_p12 = por %p3100_p7, %p3099_p3 }
 0x343   : > { %p3102_p11 = pnand %p3101_p12, %p3095_p1 }
 0x345   : > { %3105 = shalt.err (!%p3102_p11)
}
 0x346   : > { %2615 = dma.vmem_to_hbm [thread:$0]  (%p3451_p4), %s4149_s14, 2048, %s4147_s3, %s2071_s16, %s3228_s15, %s3228_s15, %s3229_s20   ;;  %v1660_v32 = vadd.f32 %v1659_v56, %v4128_v12  ;;  %v1700_v63 = vadd.f32 %v1699_v22, %v4128_v12  ;;  %v1661_v29 = vpop.f32.mrb[35].mxu0  ;;  %v1701_v34 = vpop.f32.mrb[35].mxu1  ;;  %v2546_v40 = vpack.c.bf16 %v1658_v48, %v4154_v15  ;;  %v2554_v37 = vpack.c.bf16 %v1698_v23, %v4157_v39 }
 0x347   : > { %v1662_v54 = vadd.f32 %v1661_v29, %v4139_v18  ;;  %v1702_v27 = vadd.f32 %v1701_v34, %v4139_v18  ;;  %s4224_s19 = scalar_lea.vmem [#allocation14], %s4018_s5  ;;  %v1665_v4 = vpop.f32.mrb[36].mxu0  ;;  %v1705_v11 = vpop.f32.mrb[36].mxu1  ;;  %s4376_s3 = sld [smem:[#allocation28_spill]] }
 0x348   : > { %2054 = vst [vmem:[%s4224_s19] sm:$0xff] %v2546_v40  ;;  %2062 = vst [vmem:[%s4224_s19 + $0x40] sm:$0xff] %v2554_v37  ;;  %v1666_v51 = vadd.f32 %v1665_v4, %v4128_v12  ;;  %v1706_v14 = vadd.f32 %v1705_v11, %v4128_v12  ;;  %v1667_v10 = vpop.f32.mrb[37].mxu0  ;;  %v1707_v2 = vpop.f32.mrb[37].mxu1  ;;  %s2135_s23 = sshll.u32 %s4224_s19, 4  ;;  %s3231_s13 = smov [#allocation14]   ;;  %s4271_s23 = int_to_ptr.vmem [resolvable:$true] %s2135_s23 }
 0x349   : > { %v2547_v1 = vpack.c.bf16 %v1662_v54, %v1660_v32  ;;  %v2555_v28 = vpack.c.bf16 %v1702_v27, %v1700_v63  ;;  %v1668_v46 = vadd.f32 %v1667_v10, %v4139_v18  ;;  %v1708_v20 = vadd.f32 %v1707_v2, %v4139_v18  ;;  %v1669_v30 = vpop.f32.mrb[38].mxu0  ;;  %v1709_v7 = vpop.f32.mrb[38].mxu1  ;;  %s3106_s11 = scalar_lea.vmem %s4271_s23, 2048  ;;  %s3110_s17 = sshll.u32 %s3231_s13, 4  ;;  %s3111_s17 = int_to_ptr.vmem [resolvable:$false] %s3110_s17 }
 0x34a   : > { %v1670_v31 = vadd.f32 %v1669_v30, %v4128_v12  ;;  %v1710_v19 = vadd.f32 %v1709_v7, %v4128_v12  ;;  %v1671_v61 = vpop.f32.mrb[39].mxu0  ;;  %v1711_v21 = vpop.f32.mrb[39].mxu1  ;;  %p3107_p13 = scmp.ne.s32.totalorder %s4271_s23, %s3106_s11  ;;  %s3112_s9 = scalar_lea.vmem %s3111_s17, 4096 }
 0x34b   : > { %2055 = vst [vmem:[%s4224_s19 + $0x8] sm:$0xff] %v2547_v1  ;;  %2063 = vst [vmem:[%s4224_s19 + $0x48] sm:$0xff] %v2555_v28  ;;  %v2548_v35 = vpack.c.bf16 %v1668_v46, %v1666_v51  ;;  %v2556_v36 = vpack.c.bf16 %v1708_v20, %v1706_v14  ;;  %v1672_v47 = vadd.f32 %v1671_v61, %v4139_v18  ;;  %v1675_v9 = vpop.f32.mrb[40].mxu0  ;;  %v1715_v62 = vpop.f32.mrb[40].mxu1  ;;  %p3113_p0 = scmp.lt.s32.totalorder %s4271_s23, %s3111_s17  ;;  %p3114_p2 = scmp.lt.s32.totalorder %s3112_s9, %s3106_s11 }
 0x34c   : > { %v1712_v38 = vadd.f32 %v1711_v21, %v4139_v18  ;;  %v1676_v26 = vadd.f32 %v1675_v9, %v4128_v12  ;;  %v1716_v0 = vadd.f32 %v1715_v62, %v4128_v12  ;;  %v1677_v24 = vpop.f32.mrb[41].mxu0  ;;  %v1717_v17 = vpop.f32.mrb[41].mxu1  ;;  %p3108_p5 = pnand %p3107_p13, %p3451_p4 }
 0x34d   : > { %2056 = vst [vmem:[%s4224_s19 + $0x10] sm:$0xff] %v2548_v35  ;;  %2064 = vst [vmem:[%s4224_s19 + $0x50] sm:$0xff] %v2556_v36  ;;  %v2549_v5 = vpack.c.bf16 %v1672_v47, %v1670_v31  ;;  %v1678_v3 = vadd.f32 %v1677_v24, %v4139_v18  ;;  %v1718_v50 = vadd.f32 %v1717_v17, %v4139_v18  ;;  %v1679_v42 = vpop.f32.mrb[42].mxu0  ;;  %v1719_v16 = vpop.f32.mrb[42].mxu1  ;;  %s4269_s16 = scalar_lea.hbm %s4376_s3, %s4119_s27  ;;  %p3115_p10 = por %p3114_p2, %p3113_p0 }
 0x34e   : > { %v2557_v60 = vpack.c.bf16 %v1712_v38, %v1710_v19  ;;  %v1680_v41 = vadd.f32 %v1679_v42, %v4128_v12  ;;  %v1720_v6 = vadd.f32 %v1719_v16, %v4128_v12  ;;  %v1681_v59 = vpop.f32.mrb[43].mxu0  ;;  %v1721_v52 = vpop.f32.mrb[43].mxu1  ;;  %p3109_p9 = pneg %p3108_p5 }
 0x34f   : > { %2057 = vst [vmem:[%s4224_s19 + $0x18] sm:$0xff] %v2549_v5  ;;  %v2550_v55 = vpack.c.bf16 %v1678_v3, %v1676_v26  ;;  %v2558_v58 = vpack.c.bf16 %v1718_v50, %v1716_v0  ;;  %v1682_v13 = vadd.f32 %v1681_v59, %v4139_v18  ;;  %v1722_v44 = vadd.f32 %v1721_v52, %v4139_v18  ;;  %v1685_v43 = vpop.f32.mrb[44].mxu0  ;;  %v1725_v33 = vpop.f32.mrb[44].mxu1 }
 0x350   : > { %2065 = vst [vmem:[%s4224_s19 + $0x58] sm:$0xff] %v2557_v60  ;;  %v1686_v25 = vadd.f32 %v1685_v43, %v4128_v12  ;;  %v1726_v57 = vadd.f32 %v1725_v33, %v4128_v12  ;;  %v1687_v15 = vpop.f32.mrb[45].mxu0  ;;  %v1727_v39 = vpop.f32.mrb[45].mxu1  ;;  %p3116_p1 = pnand %p3115_p10, %p3109_p9 }
 0x351   : > { %2058 = vst [vmem:[%s4224_s19 + $0x20] sm:$0xff] %v2550_v55  ;;  %2066 = vst [vmem:[%s4224_s19 + $0x60] sm:$0xff] %v2558_v58  ;;  %v2551_v49 = vpack.c.bf16 %v1682_v13, %v1680_v41  ;;  %v2559_v53 = vpack.c.bf16 %v1722_v44, %v1720_v6  ;;  %v1688_v8 = vadd.f32 %v1687_v15, %v4139_v18  ;;  %v1689_v48 = vpop.f32.mrb[46].mxu0  ;;  %v1729_v23 = vpop.f32.mrb[46].mxu1 }
 0x352   : > { %v1728_v45 = vadd.f32 %v1727_v39, %v4139_v18  ;;  %v1690_v56 = vadd.f32 %v1689_v48, %v4128_v12  ;;  %v1730_v22 = vadd.f32 %v1729_v23, %v4128_v12  ;;  %v1691_v32 = vpop.f32.mrb[47].mxu0  ;;  %v1731_v63 = vpop.f32.mrb[47].mxu1 }
 0x353   : > { %2059 = vst [vmem:[%s4224_s19 + $0x28] sm:$0xff] %v2551_v49  ;;  %2067 = vst [vmem:[%s4224_s19 + $0x68] sm:$0xff] %v2559_v53  ;;  %v2552_v29 = vpack.c.bf16 %v1688_v8, %v1686_v25  ;;  %v1692_v40 = vadd.f32 %v1691_v32, %v4139_v18  ;;  %v1732_v37 = vadd.f32 %v1731_v63, %v4139_v18 }
 0x354   : > { %v2560_v34 = vpack.c.bf16 %v1728_v45, %v1726_v57 }
 0x355   : > { %2060 = vst [vmem:[%s4224_s19 + $0x30] sm:$0xff] %v2552_v29  ;;  %v2553_v54 = vpack.c.bf16 %v1692_v40, %v1690_v56  ;;  %v2561_v27 = vpack.c.bf16 %v1732_v37, %v1730_v22 }
 0x356   : > { %2068 = vst [vmem:[%s4224_s19 + $0x70] sm:$0xff] %v2560_v34 }
 0x357   : > { %2061 = vst [vmem:[%s4224_s19 + $0x38] sm:$0xff] %v2553_v54  ;;  %2069 = vst [vmem:[%s4224_s19 + $0x78] sm:$0xff] %v2561_v27 }
 0x358   : > { %3119 = shalt.err (!%p3116_p1)
}
 0x359   : > { %s3120_s27 = scalar_lea.hbm %s4269_s16, 2048  ;;  %s3124_s1 = scalar_lea.hbm %s4376_s3, 8192 }
 0x35a   : > { %p3121_p6 = scmp.ne.s32.totalorder %s4269_s16, %s3120_s27  ;;  %p3125_p7 = scmp.lt.u32.totalorder %s4269_s16, %s4376_s3 }
 0x35b   : > { %p3126_p12 = scmp.lt.u32.totalorder %s3124_s1, %s3120_s27  ;;  %p3128_p13 = scmp.lt.u32.totalorder %s3120_s27, %s4269_s16 }
 0x35c   : > { %p3122_p8 = pnand %p3121_p6, %p3451_p4 }
 0x35d   : > { %p3127_p11 = por %p3126_p12, %p3125_p7 }
 0x35e   : > { %p3123_p3 = pneg %p3122_p8 }
 0x35f   : > { %p3129_p5 = por %p3128_p13, %p3127_p11 }
 0x361   : > { %p3130_p9 = pnand %p3129_p5, %p3123_p3 }
 0x363   : > { %3133 = shalt.err (!%p3130_p9)
}
 0x364   : > { %2617 = dma.vmem_to_hbm [thread:$0]  (%p3451_p4), %s4271_s23, 2048, %s4269_s16, %s4161_s4, %s3228_s15, %s3228_s15, %s3229_s20  }
 0x365 PF: > { %s4377_s12 = sld [smem:[#allocation20_spill]]  ;;  %s4378_s19 = sld [smem:[#allocation21_spill]] }
 0x366   : > { %p2657_p0 = scmp.ge.s32.totalorder %s3216_s8, 2 }
 0x36b   : > { %s2150_s5 = sand.u32 1, %s4377_s12   ;;  %p4379_p2 = scmp.ne.s32.totalorder %s4378_s19, 0 }
 0x36c   : > { %s2151_s14 = scalar_lea.sflag [#allocation4], %s2150_s5 }
 0x36d   : > { %p2639_p10 = pnand %p2657_p0, %p4379_p2 }
 0x36f   : > { %3179 = dma.done.wait (!%p2639_p10), %s2151_s14, 2048  }
 0x370   : > { %3181 = vsyncadd (!%p2639_p10), %s2151_s14, 4294965248  ;;  %s4380_s7 = sadd.s32 4294967294, %s3216_s8  }
 0x371   : > { %s2159_s11 = sand.u32 1, %s4380_s7  }
 0x372   : > { %s2160_s13 = scalar_lea.sflag [#allocation13], %s2159_s11 }
 0x373   : > { %3183 = dma.done.wait (!%p2639_p10), %s2160_s13, 4096  }
 0x374   : > { %3185 = vsyncadd (!%p2639_p10), %s2160_s13, 4294963200  ;;  %s29_s8 = sadd.s32 1, %s3216_s8   ;;  %s4381_s4 = sld [smem:[#allocation22_spill]] }
 0x375   : > { %p26_p4 = scmp.ge.s32.totalorder %s29_s8, 6   ;;  %s4382_s15 = smov %s4395_s24 }
 0x376   : > { %s4383_s24 = smov %s3192_s25  ;;  %s4384_s25 = smov %s3196_s26 }
 0x377   : > { %s4385_s26 = smov %s3464_s2  ;;  %s4386_s27 = smov %s3208_s29 }
 0x378   : > { %s4387_s28 = smov %s3212_s30  ;;  %s4389_s30 = smov %s4382_s15 }
 0x379   :  { %28 = sbr.rel (!%p26_p4) target bundleno = 18 (0x12), region = 133 }
 0x37a   : > { %s4388_s29 = smov %s4381_s4 }
 0x380   :  { %2174 = vsyncpa [#allocation3], 1 }
 0x381   :  { %2176 = vsyncpa [#allocation3 + $0x1], 1 }
 0x382   :  { %2177 = vsyncpa [#allocation6], 1 }
 0x383   :  { %2178 = vsyncpa [#allocation9], 1 }
 0x384   :  { %2179 = vsyncpa [#allocation4], 1 }
 0x385   :  { %2181 = vsyncpa [#allocation4 + $0x1], 1 }
 0x386   :  { %2182 = vsyncpa [#allocation13], 1 }
 0x387   :  { %2184 = vsyncpa [#allocation13 + $0x1], 1 }

</bundles_post_ra>
